<compile_context>
chip_gen: v6e
topology: v6e:2x2x1
jax: 0.10.0
libtpu: 0.0.40
codegen_flags: <defaults>
</compile_context>

<pallas_src>
import functools

import jax
import jax.numpy as jnp
import numpy as np
from jax.experimental import pallas as pl
from jax.experimental.pallas import tpu as pltpu

_VMEM = functools.partial(pl.BlockSpec, memory_space=pltpu.MemorySpace.VMEM)

# Architecture constants from the PyTorch module.
CONV1_OC, CONV1_K, CONV1_S = 32, 8, 4
CONV2_OC, CONV2_K, CONV2_S = 64, 4, 2
CONV3_OC, CONV3_K, CONV3_S = 64, 3, 1


# ----------------------------------------------------------------------------
# Fused Pallas kernel: conv stack + fc1 + LSTM cell + actor/critic heads.
# ----------------------------------------------------------------------------
def _fused_forward_kernel(p1_ref, h0_ref, c0_ref, prm_ref, out_ref, *,
                          layout, oh1, ow1, oh2, ow2, k2, s2):
    f32 = jnp.float32
    B, hid = h0_ref.shape
    A = layout["actions"]
    c1 = layout["w1"][2]

    def prm(name):
        off, r, c = layout[name]
        return prm_ref[off:off + r, 0:c]

    def mm(a, w):
        return jnp.dot(a, w, preferred_element_type=f32)

    # ---- conv1 + ReLU: ONE matmul (single MXU weight load), rows (ow, oh, b).
    a1s = jnp.maximum(mm(p1_ref[...], prm("w1")) + prm("b1"), 0.0)  # (ow1*oh1*B, c1)

    # Widen to rows (oh, b), cols (ow, c1): 8 contiguous slices + 1 lane concat.
    roh = oh1 * B
    a1 = jnp.concatenate(
        [a1s[ow * roh:(ow + 1) * roh, :] for ow in range(ow1)], axis=1)
    # a1: (oh1*B, ow1*c1)

    # ---- conv2 + ReLU: assemble ONE (oh2*ow2*B, k2*k2*c1) patch matrix from
    # contiguous (B, k2*c1) band slices, then a single matmul.
    blocks = []
    for i2 in range(oh2):
        for j2 in range(ow2):
            col0 = j2 * s2 * c1
            bands = [a1[(i2 * s2 + ki) * B:(i2 * s2 + ki) * B + B,
                        col0:col0 + k2 * c1] for ki in range(k2)]
            blocks.append(jnp.concatenate(bands, axis=1))           # (B, k2*k2*c1)
    p2 = jnp.concatenate(blocks, axis=0)                            # (oh2*ow2*B, .)
    a2 = jnp.maximum(mm(p2, prm("w2")) + prm("b2"), 0.0)            # (oh2*ow2*B, c2)

    # ---- conv3 + ReLU (1x1 spatial output): flatten per-batch (i2, j2, c2)
    # along lanes with 9 contiguous slices + 1 concat, then one contraction.
    a2f = jnp.concatenate(
        [a2[p * B:(p + 1) * B, :] for p in range(oh2 * ow2)], axis=1)  # (B, 576)
    a3 = jnp.maximum(mm(a2f, prm("w3")) + prm("b3"), 0.0)              # (B, c3)

    # ---- fc1 + ReLU
    x1 = jnp.maximum(mm(a3, prm("wf")) + prm("bf"), 0.0)               # (B, hid)

    # ---- LSTMCell (PyTorch gate order i, f, g, o): ONE matmul on [x1 | h0].
    xh = jnp.concatenate([x1, h0_ref[...]], axis=1)                    # (B, 2*hid)
    gates = mm(xh, prm("wl")) + prm("bl")                              # (B, 4*hid)
    i_g = jax.nn.sigmoid(gates[:, 0 * hid:1 * hid])
    f_g = jax.nn.sigmoid(gates[:, 1 * hid:2 * hid])
    g_g = jnp.tanh(gates[:, 2 * hid:3 * hid])
    o_g = jax.nn.sigmoid(gates[:, 3 * hid:4 * hid])
    c_new = f_g * c0_ref[...] + i_g * g_g
    h_new = o_g * jnp.tanh(c_new)

    # ---- actor + critic heads merged into ONE matmul.
    tq = mm(h_new, prm("wh")) + prm("bh")                              # (B, 2*A)
    theta = tq[:, 0:A]
    q = tq[:, A:2 * A]
    m = jnp.max(theta, axis=1, keepdims=True)
    e = jnp.exp(theta - m)
    policy = e / jnp.sum(e, axis=1, keepdims=True)     # exact divide (see review)
    # Torch's .clamp(max=1 - 1e-20); in float32 that bound rounds to 1.0.
    policy = jnp.minimum(policy, jnp.float32(1.0))
    v = jnp.sum(q * policy, axis=1, keepdims=True)

    # ---- single lane-dense output slab: [theta | policy | Q | V | h | c | 0]
    used = 3 * A + 1 + 2 * hid
    pad = out_ref.shape[1] - used
    out_ref[...] = jnp.concatenate(
        [theta, policy, q, v, h_new, c_new, jnp.zeros((B, pad), f32)],
        axis=1).astype(out_ref.dtype)


# ----------------------------------------------------------------------------
# Host-side glue (cheap, one-time / few-op) and the forward wrapper.
# ----------------------------------------------------------------------------
def _conv1_patches(x_nhwc, k, s):
    """im2col for conv1 via the k == 2*s block decomposition (~10 XLA ops).
    Returns (OW*OH*B, k*k*C) with rows in (ow, oh, b) order and columns in
    (kh, kw, cin) order, so conv1 is a single matmul."""
    B, H, W, C = x_nhwc.shape
    OH, OW = (H - k) // s + 1, (W - k) // s + 1
    # TODO(synk): generic im2col fallback for conv geometries with k != 2*s.
    assert k == 2 * s and H % s == 0 and W % s == 0, "conv1 needs k == 2*s"
    nbh, nbw = H // s, W // s
    xb = x_nhwc.reshape(B, nbh, s, nbw, s, C)
    xb = xb.transpose(0, 1, 3, 2, 4, 5).reshape(B, nbh, nbw, s * s * C)
    corners = [xb[:, bi:bi + OH, bj:bj + OW, :]
               for bi in range(2) for bj in range(2)]
    pt = jnp.stack(corners, axis=3)                   # (B, OH, OW, 4, s*s*C)
    pt = pt.reshape(B, OH, OW, 2, 2, s, s, C)
    pt = pt.transpose(0, 1, 2, 3, 5, 4, 6, 7)         # -> (kh, kw, cin) order
    pt = pt.reshape(B, OH, OW, k * k * C)
    pt = pt.transpose(2, 1, 0, 3)                     # rows (ow, oh, b)
    return pt.reshape(OW * OH * B, k * k * C), (OH, OW)


def _conv_w_mat(w_oihw):
    oc = w_oihw.shape[0]
    return jnp.transpose(w_oihw, (2, 3, 1, 0)).reshape(-1, oc)  # (kh*kw*cin, oc)


def _align8(n):
    return ((n + 7) // 8) * 8


def prepare_params(p):
    """Pre-fold PyTorch-convention params ONCE into a single VMEM-friendly
    (rows, 128) f32 slab + a static layout dict of (row_offset, rows, cols)."""
    hid = int(p["w_fc1"].shape[0])
    A = int(p["w_a"].shape[0])
    pieces = {
        "w1": _conv_w_mat(p["w1"]), "b1": p["b1"].reshape(1, -1),
        "w2": _conv_w_mat(p["w2"]), "b2": p["b2"].reshape(1, -1),
        "w3": _conv_w_mat(p["w3"]), "b3": p["b3"].reshape(1, -1),
        "wf": p["w_fc1"].T, "bf": p["b_fc1"].reshape(1, -1),
        # LSTM: stack input/hidden weights; sum the two biases.
        "wl": jnp.concatenate([p["w_ih"].T, p["w_hh"].T], axis=0),
        "bl": (p["b_ih"] + p["b_hh"]).reshape(1, -1),
        # Actor + critic heads merged along lanes.
        "wh": jnp.concatenate([p["w_a"].T, p["w_c"].T], axis=1),
        "bh": jnp.concatenate([p["b_a"], p["b_c"]]).reshape(1, -1),
    }
    order = ["w1", "b1", "w2", "b2", "w3", "b3",
             "wf", "bf", "wl", "bl", "wh", "bh"]
    width = max(128, max(int(pieces[k].shape[1]) for k in order))
    width = ((width + 127) // 128) * 128
    layout = {"hidden": hid, "actions": A}
    row = 0
    for k in order:
        r, c = (int(s) for s in pieces[k].shape)
        layout[k] = (row, r, c)
        row += _align8(r)
    nrows = _align8(row)
    slab = jnp.zeros((nrows, width), jnp.float32)
    for k in order:
        off, r, c = layout[k]
        slab = slab.at[off:off + r, 0:c].set(pieces[k].astype(jnp.float32))
    layout["rows"] = nrows
    layout["width"] = width
    return slab, layout


def actor_critic_forward(x_nhwc, h, slab, *, layout):
    """Mirrors ActorCritic.forward.  x is a batch of NHWC observations; the
    torch reorder_image (HWC->CHW) is layout-only and since conv3's spatial
    output is 1x1 the flatten order matches without any transpose."""
    h0, c0 = h
    B = x_nhwc.shape[0]
    p1, (oh1, ow1) = _conv1_patches(x_nhwc, CONV1_K, CONV1_S)
    oh2 = (oh1 - CONV2_K) // CONV2_S + 1
    ow2 = (ow1 - CONV2_K) // CONV2_S + 1
    assert (oh2 - CONV3_K) // CONV3_S + 1 == 1, "kernel assumes 1x1 conv3 out"
    assert (ow2 - CONV3_K) // CONV3_S + 1 == 1, "kernel assumes 1x1 conv3 out"

    hid = layout["hidden"]
    A = layout["actions"]
    used = 3 * A + 1 + 2 * hid
    out_w = max(128, ((used + 127) // 128) * 128)

    out = pl.pallas_call(
        functools.partial(_fused_forward_kernel, layout=layout,
                          oh1=oh1, ow1=ow1, oh2=oh2, ow2=ow2,
                          k2=CONV2_K, s2=CONV2_S),
        out_shape=jax.ShapeDtypeStruct((B, out_w), jnp.float32),
        in_specs=[_VMEM()] * 4,
        out_specs=_VMEM(),
    )(p1, h0, c0, slab)

    theta = out[:, 0:A]
    policy = out[:, A:2 * A]
    Q = out[:, 2 * A:3 * A]
    V = out[:, 3 * A:3 * A + 1]
    h_new = out[:, 3 * A + 1:3 * A + 1 + hid]
    c_new = out[:, 3 * A + 1 + hid:3 * A + 1 + 2 * hid]
    return policy, Q, V, (h_new, c_new), theta
    # TODO(synk): the reference module calls print('forward'); host-side
    # printing is intentionally omitted from the kernel path.


# ----------------------------------------------------------------------------
# Pure-JAX reference for validation
# ----------------------------------------------------------------------------
def reference_forward(x_nhwc, h, p):
    h0, c0 = h
    x = jnp.transpose(x_nhwc, (0, 3, 1, 2))

    def conv(x, w, b, s):
        y = jax.lax.conv_general_dilated(
            x, w, (s, s), "VALID", dimension_numbers=("NCHW", "OIHW", "NCHW"))
        return jax.nn.relu(y + b[None, :, None, None])

    x = conv(x, p["w1"], p["b1"], 4)
    x = conv(x, p["w2"], p["b2"], 2)
    x = conv(x, p["w3"], p["b3"], 1)
    feat = x.reshape(x.shape[0], -1)
    x1 = jax.nn.relu(feat @ p["w_fc1"].T + p["b_fc1"])
    gates = x1 @ p["w_ih"].T + p["b_ih"] + h0 @ p["w_hh"].T + p["b_hh"]
    H = h0.shape[1]
    i, f, g, o = (gates[:, :H], gates[:, H:2 * H],
                  gates[:, 2 * H:3 * H], gates[:, 3 * H:])
    c_new = jax.nn.sigmoid(f) * c0 + jax.nn.sigmoid(i) * jnp.tanh(g)
    h_new = jax.nn.sigmoid(o) * jnp.tanh(c_new)
    theta = h_new @ p["w_a"].T + p["b_a"]
    policy = jnp.minimum(jax.nn.softmax(theta, axis=1), 1.0 - 1e-20)
    Q = h_new @ p["w_c"].T + p["b_c"]
    V = jnp.sum(Q * policy, axis=1, keepdims=True)
    return policy, Q, V, (h_new, c_new), theta


# ----------------------------------------------------------------------------
if __name__ == "__main__":
    # Observation (36, 36, 4) -> conv stack -> 64 features (1x1 spatial),
    # hidden_size = 32, action_size = 6, batch = 2.
    B, OBS_H, OBS_W, C = 2, 36, 36, 4
    HIDDEN, ACTIONS = 32, 6
    STATE_SIZE = 64

    keys = jax.random.split(jax.random.PRNGKey(0), 19)

    def init(k, shape, scale=0.05):
        return (scale * jax.random.normal(k, shape)).astype(jnp.float32)

    params = {
        "w1": init(keys[0], (CONV1_OC, C, CONV1_K, CONV1_K)), "b1": init(keys[1], (CONV1_OC,)),
        "w2": init(keys[2], (CONV2_OC, CONV1_OC, CONV2_K, CONV2_K)), "b2": init(keys[3], (CONV2_OC,)),
        "w3": init(keys[4], (CONV3_OC, CONV2_OC, CONV3_K, CONV3_K)), "b3": init(keys[5], (CONV3_OC,)),
        "w_fc1": init(keys[6], (HIDDEN, STATE_SIZE)), "b_fc1": init(keys[7], (HIDDEN,)),
        "w_ih": init(keys[8], (4 * HIDDEN, HIDDEN)),
        "w_hh": init(keys[9], (4 * HIDDEN, HIDDEN)),
        "b_ih": init(keys[10], (4 * HIDDEN,)),
        "b_hh": init(keys[11], (4 * HIDDEN,)),
        "w_a": init(keys[12], (ACTIONS, HIDDEN)), "b_a": init(keys[13], (ACTIONS,)),
        "w_c": init(keys[14], (ACTIONS, HIDDEN)), "b_c": init(keys[15], (ACTIONS,)),
    }

    x = jax.random.uniform(keys[16], (B, OBS_H, OBS_W, C), dtype=jnp.float32)
    h0 = 0.1 * jax.random.normal(keys[17], (B, HIDDEN), dtype=jnp.float32)
    c0 = 0.1 * jax.random.normal(keys[18], (B, HIDDEN), dtype=jnp.float32)

    slab, layout = prepare_params(params)      # one-time parameter packing
    fwd = jax.jit(functools.partial(actor_critic_forward, layout=layout))

    policy, Q, V, (h_new, c_new), theta = fwd(x, (h0, c0), slab)
    jax.block_until_ready((policy, Q, V, h_new, c_new, theta))

    # Sanity checks against a pure-JAX reference.
    rp, rQ, rV, (rh, rc), rtheta = reference_forward(x, (h0, c0), params)
    for got, ref in [(policy, rp), (Q, rQ), (V, rV),
                     (h_new, rh), (c_new, rc), (theta, rtheta)]:
        np.testing.assert_allclose(np.asarray(got), np.asarray(ref),
                                   rtol=2e-2, atol=2e-3)

    assert policy.shape == (B, ACTIONS) and Q.shape == (B, ACTIONS)
    assert V.shape == (B, 1) and h_new.shape == (B, HIDDEN)
    assert theta.shape == (B, ACTIONS)
    assert np.allclose(np.asarray(policy).sum(axis=1), 1.0, atol=1e-4)

    print("KERNEL_OK")
</pallas_src>

<mosaic_0001>
module attributes {stable_mosaic.version = 11 : i64} {
  func.func @_fused_forward_kernel(%arg0: memref<128x256xf32, #tpu.memory_space<vmem>>, %arg1: memref<2x32xf32, #tpu.memory_space<vmem>>, %arg2: memref<2x32xf32, #tpu.memory_space<vmem>>, %arg3: memref<1552x128xf32, #tpu.memory_space<vmem>>, %arg4: memref<2x128xf32, #tpu.memory_space<vmem>>) attributes {dimension_semantics = [], scalar_prefetch = 0 : i64, scratch_operands = 0 : i64, tpu.core_type = #tpu.core_type<tc>} {
    %c0 = arith.constant 0 : index
    %c0_0 = arith.constant 0 : index
    %0 = vector.load %arg0[%c0, %c0_0] : memref<128x256xf32, #tpu.memory_space<vmem>>, vector<128x256xf32>
    %c0_1 = arith.constant 0 : index
    %c0_2 = arith.constant 0 : index
    %1 = vector.load %arg3[%c0_1, %c0_2] : memref<1552x128xf32, #tpu.memory_space<vmem>>, vector<256x32xf32>
    %cst = arith.constant dense<0.000000e+00> : vector<128x32xf32>
    %2 = tpu.matmul %0, %1, %cst {dimension_numbers = #tpu.dot_dimension_numbers<[1], [0], [0], [1], [0, 0, 1, 1], [], []>} : vector<128x256xf32>, vector<256x32xf32>, vector<128x32xf32> -> vector<128x32xf32>
    %c256 = arith.constant 256 : index
    %c0_3 = arith.constant 0 : index
    %3 = vector.load %arg3[%c256, %c0_3] : memref<1552x128xf32, #tpu.memory_space<vmem>>, vector<1x32xf32>
    %4 = vector.broadcast %3 : vector<1x32xf32> to vector<128x32xf32>
    %5 = arith.addf %2, %4 : vector<128x32xf32>
    %cst_4 = arith.constant 0.000000e+00 : f32
    %6 = vector.broadcast %cst_4 : f32 to vector<128x32xf32>
    %7 = arith.maximumf %5, %6 : vector<128x32xf32>
    %8 = vector.extract_strided_slice %7 {offsets = [0, 0], sizes = [16, 32], strides = [1, 1]} : vector<128x32xf32> to vector<16x32xf32>
    %9 = vector.extract_strided_slice %7 {offsets = [16, 0], sizes = [16, 32], strides = [1, 1]} : vector<128x32xf32> to vector<16x32xf32>
    %10 = vector.extract_strided_slice %7 {offsets = [32, 0], sizes = [16, 32], strides = [1, 1]} : vector<128x32xf32> to vector<16x32xf32>
    %11 = vector.extract_strided_slice %7 {offsets = [48, 0], sizes = [16, 32], strides = [1, 1]} : vector<128x32xf32> to vector<16x32xf32>
    %12 = vector.extract_strided_slice %7 {offsets = [64, 0], sizes = [16, 32], strides = [1, 1]} : vector<128x32xf32> to vector<16x32xf32>
    %13 = vector.extract_strided_slice %7 {offsets = [80, 0], sizes = [16, 32], strides = [1, 1]} : vector<128x32xf32> to vector<16x32xf32>
    %14 = vector.extract_strided_slice %7 {offsets = [96, 0], sizes = [16, 32], strides = [1, 1]} : vector<128x32xf32> to vector<16x32xf32>
    %15 = vector.extract_strided_slice %7 {offsets = [112, 0], sizes = [16, 32], strides = [1, 1]} : vector<128x32xf32> to vector<16x32xf32>
    %16 = tpu.concatenate %8, %9, %10, %11, %12, %13, %14, %15 in 1 : vector<16x32xf32>, vector<16x32xf32>, vector<16x32xf32>, vector<16x32xf32>, vector<16x32xf32>, vector<16x32xf32>, vector<16x32xf32>, vector<16x32xf32> -> vector<16x256xf32>
    %17 = vector.extract_strided_slice %16 {offsets = [0, 0], sizes = [2, 128], strides = [1, 1]} : vector<16x256xf32> to vector<2x128xf32>
    %18 = vector.extract_strided_slice %16 {offsets = [2, 0], sizes = [2, 128], strides = [1, 1]} : vector<16x256xf32> to vector<2x128xf32>
    %19 = vector.extract_strided_slice %16 {offsets = [4, 0], sizes = [2, 128], strides = [1, 1]} : vector<16x256xf32> to vector<2x128xf32>
    %20 = vector.extract_strided_slice %16 {offsets = [6, 0], sizes = [2, 128], strides = [1, 1]} : vector<16x256xf32> to vector<2x128xf32>
    %21 = tpu.concatenate %17, %18, %19, %20 in 1 : vector<2x128xf32>, vector<2x128xf32>, vector<2x128xf32>, vector<2x128xf32> -> vector<2x512xf32>
    %22 = vector.extract_strided_slice %16 {offsets = [0, 64], sizes = [2, 128], strides = [1, 1]} : vector<16x256xf32> to vector<2x128xf32>
    %23 = vector.extract_strided_slice %16 {offsets = [2, 64], sizes = [2, 128], strides = [1, 1]} : vector<16x256xf32> to vector<2x128xf32>
    %24 = vector.extract_strided_slice %16 {offsets = [4, 64], sizes = [2, 128], strides = [1, 1]} : vector<16x256xf32> to vector<2x128xf32>
    %25 = vector.extract_strided_slice %16 {offsets = [6, 64], sizes = [2, 128], strides = [1, 1]} : vector<16x256xf32> to vector<2x128xf32>
    %26 = tpu.concatenate %22, %23, %24, %25 in 1 : vector<2x128xf32>, vector<2x128xf32>, vector<2x128xf32>, vector<2x128xf32> -> vector<2x512xf32>
    %27 = vector.extract_strided_slice %16 {offsets = [0, 128], sizes = [2, 128], strides = [1, 1]} : vector<16x256xf32> to vector<2x128xf32>
    %28 = vector.extract_strided_slice %16 {offsets = [2, 128], sizes = [2, 128], strides = [1, 1]} : vector<16x256xf32> to vector<2x128xf32>
    %29 = vector.extract_strided_slice %16 {offsets = [4, 128], sizes = [2, 128], strides = [1, 1]} : vector<16x256xf32> to vector<2x128xf32>
    %30 = vector.extract_strided_slice %16 {offsets = [6, 128], sizes = [2, 128], strides = [1, 1]} : vector<16x256xf32> to vector<2x128xf32>
    %31 = tpu.concatenate %27, %28, %29, %30 in 1 : vector<2x128xf32>, vector<2x128xf32>, vector<2x128xf32>, vector<2x128xf32> -> vector<2x512xf32>
    %32 = vector.extract_strided_slice %16 {offsets = [4, 0], sizes = [2, 128], strides = [1, 1]} : vector<16x256xf32> to vector<2x128xf32>
    %33 = vector.extract_strided_slice %16 {offsets = [6, 0], sizes = [2, 128], strides = [1, 1]} : vector<16x256xf32> to vector<2x128xf32>
    %34 = vector.extract_strided_slice %16 {offsets = [8, 0], sizes = [2, 128], strides = [1, 1]} : vector<16x256xf32> to vector<2x128xf32>
    %35 = vector.extract_strided_slice %16 {offsets = [10, 0], sizes = [2, 128], strides = [1, 1]} : vector<16x256xf32> to vector<2x128xf32>
    %36 = tpu.concatenate %32, %33, %34, %35 in 1 : vector<2x128xf32>, vector<2x128xf32>, vector<2x128xf32>, vector<2x128xf32> -> vector<2x512xf32>
    %37 = vector.extract_strided_slice %16 {offsets = [4, 64], sizes = [2, 128], strides = [1, 1]} : vector<16x256xf32> to vector<2x128xf32>
    %38 = vector.extract_strided_slice %16 {offsets = [6, 64], sizes = [2, 128], strides = [1, 1]} : vector<16x256xf32> to vector<2x128xf32>
    %39 = vector.extract_strided_slice %16 {offsets = [8, 64], sizes = [2, 128], strides = [1, 1]} : vector<16x256xf32> to vector<2x128xf32>
    %40 = vector.extract_strided_slice %16 {offsets = [10, 64], sizes = [2, 128], strides = [1, 1]} : vector<16x256xf32> to vector<2x128xf32>
    %41 = tpu.concatenate %37, %38, %39, %40 in 1 : vector<2x128xf32>, vector<2x128xf32>, vector<2x128xf32>, vector<2x128xf32> -> vector<2x512xf32>
    %42 = vector.extract_strided_slice %16 {offsets = [4, 128], sizes = [2, 128], strides = [1, 1]} : vector<16x256xf32> to vector<2x128xf32>
    %43 = vector.extract_strided_slice %16 {offsets = [6, 128], sizes = [2, 128], strides = [1, 1]} : vector<16x256xf32> to vector<2x128xf32>
    %44 = vector.extract_strided_slice %16 {offsets = [8, 128], sizes = [2, 128], strides = [1, 1]} : vector<16x256xf32> to vector<2x128xf32>
    %45 = vector.extract_strided_slice %16 {offsets = [10, 128], sizes = [2, 128], strides = [1, 1]} : vector<16x256xf32> to vector<2x128xf32>
    %46 = tpu.concatenate %42, %43, %44, %45 in 1 : vector<2x128xf32>, vector<2x128xf32>, vector<2x128xf32>, vector<2x128xf32> -> vector<2x512xf32>
    %47 = vector.extract_strided_slice %16 {offsets = [8, 0], sizes = [2, 128], strides = [1, 1]} : vector<16x256xf32> to vector<2x128xf32>
    %48 = vector.extract_strided_slice %16 {offsets = [10, 0], sizes = [2, 128], strides = [1, 1]} : vector<16x256xf32> to vector<2x128xf32>
    %49 = vector.extract_strided_slice %16 {offsets = [12, 0], sizes = [2, 128], strides = [1, 1]} : vector<16x256xf32> to vector<2x128xf32>
    %50 = vector.extract_strided_slice %16 {offsets = [14, 0], sizes = [2, 128], strides = [1, 1]} : vector<16x256xf32> to vector<2x128xf32>
    %51 = tpu.concatenate %47, %48, %49, %50 in 1 : vector<2x128xf32>, vector<2x128xf32>, vector<2x128xf32>, vector<2x128xf32> -> vector<2x512xf32>
    %52 = vector.extract_strided_slice %16 {offsets = [8, 64], sizes = [2, 128], strides = [1, 1]} : vector<16x256xf32> to vector<2x128xf32>
    %53 = vector.extract_strided_slice %16 {offsets = [10, 64], sizes = [2, 128], strides = [1, 1]} : vector<16x256xf32> to vector<2x128xf32>
    %54 = vector.extract_strided_slice %16 {offsets = [12, 64], sizes = [2, 128], strides = [1, 1]} : vector<16x256xf32> to vector<2x128xf32>
    %55 = vector.extract_strided_slice %16 {offsets = [14, 64], sizes = [2, 128], strides = [1, 1]} : vector<16x256xf32> to vector<2x128xf32>
    %56 = tpu.concatenate %52, %53, %54, %55 in 1 : vector<2x128xf32>, vector<2x128xf32>, vector<2x128xf32>, vector<2x128xf32> -> vector<2x512xf32>
    %57 = vector.extract_strided_slice %16 {offsets = [8, 128], sizes = [2, 128], strides = [1, 1]} : vector<16x256xf32> to vector<2x128xf32>
    %58 = vector.extract_strided_slice %16 {offsets = [10, 128], sizes = [2, 128], strides = [1, 1]} : vector<16x256xf32> to vector<2x128xf32>
    %59 = vector.extract_strided_slice %16 {offsets = [12, 128], sizes = [2, 128], strides = [1, 1]} : vector<16x256xf32> to vector<2x128xf32>
    %60 = vector.extract_strided_slice %16 {offsets = [14, 128], sizes = [2, 128], strides = [1, 1]} : vector<16x256xf32> to vector<2x128xf32>
    %61 = tpu.concatenate %57, %58, %59, %60 in 1 : vector<2x128xf32>, vector<2x128xf32>, vector<2x128xf32>, vector<2x128xf32> -> vector<2x512xf32>
    %62 = tpu.concatenate %21, %26, %31, %36, %41, %46, %51, %56, %61 in 0 : vector<2x512xf32>, vector<2x512xf32>, vector<2x512xf32>, vector<2x512xf32>, vector<2x512xf32>, vector<2x512xf32>, vector<2x512xf32>, vector<2x512xf32>, vector<2x512xf32> -> vector<18x512xf32>
    %c264 = arith.constant 264 : index
    %c0_5 = arith.constant 0 : index
    %63 = vector.load %arg3[%c264, %c0_5] : memref<1552x128xf32, #tpu.memory_space<vmem>>, vector<512x64xf32>
    %cst_6 = arith.constant dense<0.000000e+00> : vector<18x64xf32>
    %64 = tpu.matmul %62, %63, %cst_6 {dimension_numbers = #tpu.dot_dimension_numbers<[1], [0], [0], [1], [0, 0, 1, 1], [], []>} : vector<18x512xf32>, vector<512x64xf32>, vector<18x64xf32> -> vector<18x64xf32>
    %c776 = arith.constant 776 : index
    %c0_7 = arith.constant 0 : index
    %65 = vector.load %arg3[%c776, %c0_7] : memref<1552x128xf32, #tpu.memory_space<vmem>>, vector<1x64xf32>
    %66 = vector.broadcast %65 : vector<1x64xf32> to vector<18x64xf32>
    %67 = arith.addf %64, %66 : vector<18x64xf32>
    %cst_8 = arith.constant 0.000000e+00 : f32
    %68 = vector.broadcast %cst_8 : f32 to vector<18x64xf32>
    %69 = arith.maximumf %67, %68 : vector<18x64xf32>
    %70 = vector.extract_strided_slice %69 {offsets = [0, 0], sizes = [2, 64], strides = [1, 1]} : vector<18x64xf32> to vector<2x64xf32>
    %71 = vector.extract_strided_slice %69 {offsets = [2, 0], sizes = [2, 64], strides = [1, 1]} : vector<18x64xf32> to vector<2x64xf32>
    %72 = vector.extract_strided_slice %69 {offsets = [4, 0], sizes = [2, 64], strides = [1, 1]} : vector<18x64xf32> to vector<2x64xf32>
    %73 = vector.extract_strided_slice %69 {offsets = [6, 0], sizes = [2, 64], strides = [1, 1]} : vector<18x64xf32> to vector<2x64xf32>
    %74 = vector.extract_strided_slice %69 {offsets = [8, 0], sizes = [2, 64], strides = [1, 1]} : vector<18x64xf32> to vector<2x64xf32>
    %75 = vector.extract_strided_slice %69 {offsets = [10, 0], sizes = [2, 64], strides = [1, 1]} : vector<18x64xf32> to vector<2x64xf32>
    %76 = vector.extract_strided_slice %69 {offsets = [12, 0], sizes = [2, 64], strides = [1, 1]} : vector<18x64xf32> to vector<2x64xf32>
    %77 = vector.extract_strided_slice %69 {offsets = [14, 0], sizes = [2, 64], strides = [1, 1]} : vector<18x64xf32> to vector<2x64xf32>
    %78 = vector.extract_strided_slice %69 {offsets = [16, 0], sizes = [2, 64], strides = [1, 1]} : vector<18x64xf32> to vector<2x64xf32>
    %79 = tpu.concatenate %70, %71, %72, %73, %74, %75, %76, %77, %78 in 1 : vector<2x64xf32>, vector<2x64xf32>, vector<2x64xf32>, vector<2x64xf32>, vector<2x64xf32>, vector<2x64xf32>, vector<2x64xf32>, vector<2x64xf32>, vector<2x64xf32> -> vector<2x576xf32>
    %c784 = arith.constant 784 : index
    %c0_9 = arith.constant 0 : index
    %80 = vector.load %arg3[%c784, %c0_9] : memref<1552x128xf32, #tpu.memory_space<vmem>>, vector<576x64xf32>
    %cst_10 = arith.constant dense<0.000000e+00> : vector<2x64xf32>
    %81 = tpu.matmul %79, %80, %cst_10 {dimension_numbers = #tpu.dot_dimension_numbers<[1], [0], [0], [1], [0, 0, 1, 1], [], []>} : vector<2x576xf32>, vector<576x64xf32>, vector<2x64xf32> -> vector<2x64xf32>
    %c1360 = arith.constant 1360 : index
    %c0_11 = arith.constant 0 : index
    %82 = vector.load %arg3[%c1360, %c0_11] : memref<1552x128xf32, #tpu.memory_space<vmem>>, vector<1x64xf32>
    %83 = vector.broadcast %82 : vector<1x64xf32> to vector<2x64xf32>
    %84 = arith.addf %81, %83 : vector<2x64xf32>
    %cst_12 = arith.constant 0.000000e+00 : f32
    %85 = vector.broadcast %cst_12 : f32 to vector<2x64xf32>
    %86 = arith.maximumf %84, %85 : vector<2x64xf32>
    %c1368 = arith.constant 1368 : index
    %c0_13 = arith.constant 0 : index
    %87 = vector.load %arg3[%c1368, %c0_13] : memref<1552x128xf32, #tpu.memory_space<vmem>>, vector<64x32xf32>
    %cst_14 = arith.constant dense<0.000000e+00> : vector<2x32xf32>
    %88 = tpu.matmul %86, %87, %cst_14 {dimension_numbers = #tpu.dot_dimension_numbers<[1], [0], [0], [1], [0, 0, 1, 1], [], []>} : vector<2x64xf32>, vector<64x32xf32>, vector<2x32xf32> -> vector<2x32xf32>
    %c1432 = arith.constant 1432 : index
    %c0_15 = arith.constant 0 : index
    %89 = vector.load %arg3[%c1432, %c0_15] : memref<1552x128xf32, #tpu.memory_space<vmem>>, vector<1x32xf32>
    %90 = vector.broadcast %89 : vector<1x32xf32> to vector<2x32xf32>
    %91 = arith.addf %88, %90 : vector<2x32xf32>
    %cst_16 = arith.constant 0.000000e+00 : f32
    %92 = vector.broadcast %cst_16 : f32 to vector<2x32xf32>
    %93 = arith.maximumf %91, %92 : vector<2x32xf32>
    %c0_17 = arith.constant 0 : index
    %c0_18 = arith.constant 0 : index
    %94 = vector.load %arg1[%c0_17, %c0_18] : memref<2x32xf32, #tpu.memory_space<vmem>>, vector<2x32xf32>
    %95 = tpu.concatenate %93, %94 in 1 : vector<2x32xf32>, vector<2x32xf32> -> vector<2x64xf32>
    %c1440 = arith.constant 1440 : index
    %c0_19 = arith.constant 0 : index
    %96 = vector.load %arg3[%c1440, %c0_19] : memref<1552x128xf32, #tpu.memory_space<vmem>>, vector<64x128xf32>
    %cst_20 = arith.constant dense<0.000000e+00> : vector<2x128xf32>
    %97 = tpu.matmul %95, %96, %cst_20 {dimension_numbers = #tpu.dot_dimension_numbers<[1], [0], [0], [1], [0, 0, 1, 1], [], []>} : vector<2x64xf32>, vector<64x128xf32>, vector<2x128xf32> -> vector<2x128xf32>
    %c1504 = arith.constant 1504 : index
    %c0_21 = arith.constant 0 : index
    %98 = vector.load %arg3[%c1504, %c0_21] : memref<1552x128xf32, #tpu.memory_space<vmem>>, vector<1x128xf32>
    %99 = vector.broadcast %98 : vector<1x128xf32> to vector<2x128xf32>
    %100 = arith.addf %97, %99 : vector<2x128xf32>
    %101 = vector.extract_strided_slice %100 {offsets = [0, 0], sizes = [2, 32], strides = [1, 1]} : vector<2x128xf32> to vector<2x32xf32>
    %102 = arith.negf %101 : vector<2x32xf32>
    %103 = math.exp %102 : vector<2x32xf32>
    %cst_22 = arith.constant 1.000000e+00 : f32
    %104 = vector.broadcast %cst_22 : f32 to vector<2x32xf32>
    %105 = arith.addf %104, %103 : vector<2x32xf32>
    %106 = arith.divf %104, %105 : vector<2x32xf32>
    %107 = vector.extract_strided_slice %100 {offsets = [0, 32], sizes = [2, 32], strides = [1, 1]} : vector<2x128xf32> to vector<2x32xf32>
    %108 = arith.negf %107 : vector<2x32xf32>
    %109 = math.exp %108 : vector<2x32xf32>
    %cst_23 = arith.constant 1.000000e+00 : f32
    %110 = vector.broadcast %cst_23 : f32 to vector<2x32xf32>
    %111 = arith.addf %110, %109 : vector<2x32xf32>
    %112 = arith.divf %110, %111 : vector<2x32xf32>
    %113 = vector.extract_strided_slice %100 {offsets = [0, 64], sizes = [2, 32], strides = [1, 1]} : vector<2x128xf32> to vector<2x32xf32>
    %114 = math.tanh %113 : vector<2x32xf32>
    %115 = vector.extract_strided_slice %100 {offsets = [0, 96], sizes = [2, 32], strides = [1, 1]} : vector<2x128xf32> to vector<2x32xf32>
    %116 = arith.negf %115 : vector<2x32xf32>
    %117 = math.exp %116 : vector<2x32xf32>
    %cst_24 = arith.constant 1.000000e+00 : f32
    %118 = vector.broadcast %cst_24 : f32 to vector<2x32xf32>
    %119 = arith.addf %118, %117 : vector<2x32xf32>
    %120 = arith.divf %118, %119 : vector<2x32xf32>
    %c0_25 = arith.constant 0 : index
    %c0_26 = arith.constant 0 : index
    %121 = vector.load %arg2[%c0_25, %c0_26] : memref<2x32xf32, #tpu.memory_space<vmem>>, vector<2x32xf32>
    %122 = arith.mulf %112, %121 : vector<2x32xf32>
    %123 = arith.mulf %106, %114 : vector<2x32xf32>
    %124 = arith.addf %122, %123 : vector<2x32xf32>
    %125 = math.tanh %124 : vector<2x32xf32>
    %126 = arith.mulf %120, %125 : vector<2x32xf32>
    %c1512 = arith.constant 1512 : index
    %c0_27 = arith.constant 0 : index
    %127 = vector.load %arg3[%c1512, %c0_27] : memref<1552x128xf32, #tpu.memory_space<vmem>>, vector<32x12xf32>
    %cst_28 = arith.constant dense<0.000000e+00> : vector<2x12xf32>
    %128 = tpu.matmul %126, %127, %cst_28 {dimension_numbers = #tpu.dot_dimension_numbers<[1], [0], [0], [1], [0, 0, 1, 1], [], []>} : vector<2x32xf32>, vector<32x12xf32>, vector<2x12xf32> -> vector<2x12xf32>
    %c1544 = arith.constant 1544 : index
    %c0_29 = arith.constant 0 : index
    %129 = vector.load %arg3[%c1544, %c0_29] : memref<1552x128xf32, #tpu.memory_space<vmem>>, vector<1x12xf32>
    %130 = vector.broadcast %129 : vector<1x12xf32> to vector<2x12xf32>
    %131 = arith.addf %128, %130 : vector<2x12xf32>
    %132 = vector.extract_strided_slice %131 {offsets = [0, 0], sizes = [2, 6], strides = [1, 1]} : vector<2x12xf32> to vector<2x6xf32>
    %133 = vector.extract_strided_slice %131 {offsets = [0, 6], sizes = [2, 6], strides = [1, 1]} : vector<2x12xf32> to vector<2x6xf32>
    %cst_30 = arith.constant dense<0xFF800000> : vector<2xf32>
    %134 = vector.multi_reduction <maximumf>, %132, %cst_30 [1] : vector<2x6xf32> to vector<2xf32>
    %135 = vector.shape_cast %134 : vector<2xf32> to vector<2x1xf32>
    %136 = vector.broadcast %135 : vector<2x1xf32> to vector<2x6xf32>
    %137 = arith.subf %132, %136 : vector<2x6xf32>
    %138 = math.exp %137 : vector<2x6xf32>
    %cst_31 = arith.constant dense<0.000000e+00> : vector<2xf32>
    %139 = vector.multi_reduction <add>, %138, %cst_31 [1] : vector<2x6xf32> to vector<2xf32>
    %140 = vector.shape_cast %139 : vector<2xf32> to vector<2x1xf32>
    %141 = vector.broadcast %140 : vector<2x1xf32> to vector<2x6xf32>
    %142 = arith.divf %138, %141 : vector<2x6xf32>
    %cst_32 = arith.constant 1.000000e+00 : f32
    %143 = vector.broadcast %cst_32 : f32 to vector<2x6xf32>
    %144 = arith.minimumf %142, %143 : vector<2x6xf32>
    %145 = arith.mulf %133, %144 : vector<2x6xf32>
    %cst_33 = arith.constant dense<0.000000e+00> : vector<2xf32>
    %146 = vector.multi_reduction <add>, %145, %cst_33 [1] : vector<2x6xf32> to vector<2xf32>
    %147 = vector.shape_cast %146 : vector<2xf32> to vector<2x1xf32>
    %cst_34 = arith.constant 0.000000e+00 : f32
    %148 = vector.broadcast %cst_34 : f32 to vector<2x45xf32>
    %149 = tpu.concatenate %132, %144, %133, %147, %126, %124, %148 in 1 : vector<2x6xf32>, vector<2x6xf32>, vector<2x6xf32>, vector<2x1xf32>, vector<2x32xf32>, vector<2x32xf32>, vector<2x45xf32> -> vector<2x128xf32>
    %c0_35 = arith.constant 0 : index
    %c0_36 = arith.constant 0 : index
    %150 = vector.load %arg4[%c0_35, %c0_36] : memref<2x128xf32, #tpu.memory_space<vmem>>, vector<2x128xf32>
    tpu.vector_store %arg4[%c0_35, %c0_36], %149 {strides = array<i32>} : memref<2x128xf32, #tpu.memory_space<vmem>>, vector<2x128xf32>,
    return
  }
}

</mosaic_0001>

<bundles_post_ra>
// kernel: actor_critic_forward.1
= control target key start
LH: loop header
LB: loop body
LE: loop exit
PB: predicated region body
PF: predicated region fallthrough
CT: control target
= control target key end

     0   :  { %s1789_s15 = smov 64   ;;  %s1790_s16 = smov 96   ;;  %vm295_vm0 = vcmask 261120   ;;  %vm298_vm1 = vcmask 523264   ;;  %vm301_vm2 = vcmask 785408   ;;  %vm423_vm3 = vcmask 1041408   ;;  %s2728_s3 = inlined_call_operand.vmem [shape: f32[1552,128], index: 3, kind: input, shape index: {}]   ;;  %s2729_s0 = inlined_call_operand.vmem [shape: f32[128,256], index: 0, kind: input, shape index: {}]   ;;  %s2730_s1 = inlined_call_operand.vmem [shape: f32[2,32], index: 1, kind: input, shape index: {}]   ;;  %s2731_s2 = inlined_call_operand.vmem [shape: f32[2,32], index: 2, kind: input, shape index: {}]   ;;  %s2732_s4 = inlined_call_operand.vmem [shape: f32[2,128], index: 4, kind: output, shape index: {}]  }
   0x1   :  { %v80_v0 = vld [vmem:[%s2728_s3 + $0xf8] sm:$0xff]  ;;  %v79_v2 = vld [vmem:[%s2728_s3 + $0xf0] sm:$0xff]  ;;  %v78_v4 = vld [vmem:[%s2728_s3 + $0xe8] sm:$0xff]  ;;  %vm428_vm4 = vcmask 1043456   ;;  %vm433_vm5 = vcmask 1045504   ;;  %vm1792_vm6 = vmmov 0  }
   0x2   :  { %v64_v1 = vld [vmem:[%s2728_s3 + $0x78] sm:$0xff]  ;;  %1355 = vmatprep.subr.mxu0 %v80_v0  ;;  %v63_v3 = vld [vmem:[%s2728_s3 + $0x70] sm:$0xff]  ;;  %v62_v5 = vld [vmem:[%s2728_s3 + $0x68] sm:$0xff]  ;;  %vm1291_vm7 = vcmask 41984   ;;  %vm1327_vm8 = vcmask 48128   ;;  %vm1329_vm9 = vcmask 97280  }
   0x3   :  { %1356 = vmatpush3.msra.mxu0 %v64_v1  ;;  %v77_v6 = vld [vmem:[%s2728_s3 + $0xe0] sm:$0xff]  ;;  %v76_v8 = vld [vmem:[%s2728_s3 + $0xd8] sm:$0xff]  ;;  %v75_v10 = vld [vmem:[%s2728_s3 + $0xd0] sm:$0xff]  ;;  %vm1331_vm10 = vcmask 146432   ;;  %vm1333_vm11 = vcmask 154624   ;;  %vm1335_vm12 = vcmask 416768  }
   0x4   :  { %1357 = vmatprep.subr.mxu0 %v79_v2  ;;  %v61_v7 = vld [vmem:[%s2728_s3 + $0x60] sm:$0xff]  ;;  %v60_v9 = vld [vmem:[%s2728_s3 + $0x58] sm:$0xff]  ;;  %v59_v11 = vld [vmem:[%s2728_s3 + $0x50] sm:$0xff]  ;;  %vm1337_vm13 = vcmask 678912  }
   0x5   :  { %1358 = vmatpush3.msra.mxu0 %v63_v3  ;;  %v74_v12 = vld [vmem:[%s2728_s3 + $0xc8] sm:$0xff]  ;;  %v73_v15 = vld [vmem:[%s2728_s3 + $0xc0] sm:$0xff]  ;;  %v72_v17 = vld [vmem:[%s2728_s3 + $0xb8] sm:$0xff] }
   0x6   :  { %1359 = vmatprep.subr.mxu0 %v78_v4  ;;  %v18_v13 = vld [vmem:[%s2729_s0 + $0x8] sm:$0xff]  ;;  %v57_v16 = vld [vmem:[%s2728_s3 + $0x40] sm:$0xff]  ;;  %v56_v18 = vld [vmem:[%s2728_s3 + $0x38] sm:$0xff] }
   0x7   :  { %1360 = vmatpush3.msra.mxu0 %v62_v5  ;;  %v58_v14 = vld [vmem:[%s2728_s3 + $0x48] sm:$0xff]  ;;  %150 = vmatprep.mubr.f32.mxu0 %v18_v13  ;;  %v71_v19 = vld [vmem:[%s2728_s3 + $0xb0] sm:$0xff]  ;;  %v69_v23 = vld [vmem:[%s2728_s3 + $0xa0] sm:$0xff] }
   0x8   :  { %1361 = vmatprep.subr.mxu0 %v77_v6  ;;  %v55_v20 = vld [vmem:[%s2728_s3 + $0x30] sm:$0xff]  ;;  %v70_v21 = vld [vmem:[%s2728_s3 + $0xa8] sm:$0xff]  ;;  %v53_v24 = vld [vmem:[%s2728_s3 + $0x20] sm:$0xff] }
   0x9   :  { %1362 = vmatpush3.msra.mxu0 %v61_v7  ;;  %v54_v22 = vld [vmem:[%s2728_s3 + $0x28] sm:$0xff]  ;;  %v68_v25 = vld [vmem:[%s2728_s3 + $0x98] sm:$0xff]  ;;  %v67_v27 = vld [vmem:[%s2728_s3 + $0x90] sm:$0xff] }
   0xa   :  { %1363 = vmatprep.subr.mxu0 %v76_v8  ;;  %v52_v26 = vld [vmem:[%s2728_s3 + $0x18] sm:$0xff]  ;;  %v51_v28 = vld [vmem:[%s2728_s3 + $0x10] sm:$0xff]  ;;  %v66_v29 = vld [vmem:[%s2728_s3 + $0x88] sm:$0xff] }
   0xb   :  { %1364 = vmatpush3.msra.mxu0 %v60_v9  ;;  %v50_v30 = vld [vmem:[%s2728_s3 + $0x8] sm:$0xff]  ;;  %v65_v31 = vld [vmem:[%s2728_s3 + $0x80] sm:$0xff]  ;;  %v20_v34 = vld [vmem:[%s2729_s0 + $0x18] sm:$0xff] }
   0xc   :  { %1365 = vmatprep.subr.mxu0 %v75_v10  ;;  %v49_v32 = vld [vmem:[%s2728_s3] sm:$0xff]  ;;  %v19_v35 = vld [vmem:[%s2729_s0 + $0x10] sm:$0xff]  ;;  %v22_v36 = vld [vmem:[%s2729_s0 + $0x28] sm:$0xff] }
   0xd   :  { %1366 = vmatpush3.msra.mxu0 %v59_v11  ;;  %v17_v33 = vld [vmem:[%s2729_s0] sm:$0xff]  ;;  %v24_v38 = vld [vmem:[%s2729_s0 + $0x38] sm:$0xff]  ;;  %v23_v39 = vld [vmem:[%s2729_s0 + $0x30] sm:$0xff] }
   0xe   :  { %1367 = vmatprep.subr.mxu0 %v74_v12  ;;  %v21_v37 = vld [vmem:[%s2729_s0 + $0x20] sm:$0xff]  ;;  %v26_v40 = vld [vmem:[%s2729_s0 + $0x48] sm:$0xff]  ;;  %v28_v42 = vld [vmem:[%s2729_s0 + $0x58] sm:$0xff] }
   0xf   :  { %1368 = vmatpush3.msra.mxu0 %v58_v14  ;;  %v25_v41 = vld [vmem:[%s2729_s0 + $0x40] sm:$0xff]  ;;  %v27_v43 = vld [vmem:[%s2729_s0 + $0x50] sm:$0xff]  ;;  %v30_v44 = vld [vmem:[%s2729_s0 + $0x68] sm:$0xff] }
  0x10   :  { %1369 = vmatprep.subr.mxu0 %v73_v15  ;;  %v29_v45 = vld [vmem:[%s2729_s0 + $0x60] sm:$0xff]  ;;  %v32_v46 = vld [vmem:[%s2729_s0 + $0x78] sm:$0xff]  ;;  %v31_v47 = vld [vmem:[%s2729_s0 + $0x70] sm:$0xff] }
  0x11   :  { %1370 = vmatpush3.msra.mxu0 %v57_v16  ;;  %v34_v48 = vld [vmem:[%s2729_s0 + $0x88] sm:$0xff]  ;;  %v33_v49 = vld [vmem:[%s2729_s0 + $0x80] sm:$0xff]  ;;  %v36_v50 = vld [vmem:[%s2729_s0 + $0x98] sm:$0xff] }
  0x12   :  { %1371 = vmatprep.subr.mxu0 %v72_v17  ;;  %v35_v51 = vld [vmem:[%s2729_s0 + $0x90] sm:$0xff]  ;;  %v38_v52 = vld [vmem:[%s2729_s0 + $0xa8] sm:$0xff]  ;;  %v37_v53 = vld [vmem:[%s2729_s0 + $0xa0] sm:$0xff] }
  0x13   :  { %1372 = vmatpush3.msra.mxu0 %v56_v18  ;;  %v40_v54 = vld [vmem:[%s2729_s0 + $0xb8] sm:$0xff]  ;;  %v39_v55 = vld [vmem:[%s2729_s0 + $0xb0] sm:$0xff]  ;;  %v42_v56 = vld [vmem:[%s2729_s0 + $0xc8] sm:$0xff] }
  0x14   :  { %1373 = vmatprep.subr.mxu0 %v71_v19  ;;  %v41_v57 = vld [vmem:[%s2729_s0 + $0xc0] sm:$0xff]  ;;  %v44_v58 = vld [vmem:[%s2729_s0 + $0xd8] sm:$0xff]  ;;  %v43_v59 = vld [vmem:[%s2729_s0 + $0xd0] sm:$0xff] }
  0x15   :  { %1374 = vmatpush3.msra.mxu0 %v55_v20  ;;  %v46_v60 = vld [vmem:[%s2729_s0 + $0xe8] sm:$0xff]  ;;  %v45_v61 = vld [vmem:[%s2729_s0 + $0xe0] sm:$0xff]  ;;  %v48_v62 = vld [vmem:[%s2729_s0 + $0xf8] sm:$0xff] }
  0x16   :  { %1375 = vmatprep.subr.mxu0 %v70_v21  ;;  %v47_v63 = vld [vmem:[%s2729_s0 + $0xf0] sm:$0xff]  ;;  %v2017_v1 = vld [vmem:[%s2728_s3 + $0x100] ss:$0 sm:$0xff]  ;;  %s1788_s0 = smov 32  }
  0x17   :  { %1376 = vmatpush3.msra.mxu0 %v54_v22 }
  0x18   :  { %1377 = vmatprep.subr.mxu0 %v69_v23 }
  0x19   :  { %1378 = vmatpush3.msra.mxu0 %v53_v24 }
  0x1a   :  { %1379 = vmatprep.subr.mxu0 %v68_v25 }
  0x1b   :  { %1380 = vmatpush3.msra.mxu0 %v52_v26 }
  0x1c   :  { %1381 = vmatprep.subr.mxu0 %v67_v27 }
  0x1d   :  { %1382 = vmatpush3.msra.mxu0 %v51_v28 }
  0x1e   :  { %1383 = vmatprep.subr.mxu0 %v66_v29 }
  0x1f   :  { %1384 = vmatpush3.msra.mxu0 %v50_v30 }
  0x20   :  { %1385 = vmatprep.subr.mxu0 %v65_v31 }
  0x21   :  { %1386 = vmatpush3.msra.mxu0 %v49_v32 }
  0x22   :  { %151 = vmatmul.mubr.f32.vlgmr.msra.gmra.mxu0 %v17_v33 }
  0x23   :  { %155 = vmatprep.mubr.f32.mxu0 %v20_v34 }
  0x26   :  { %156 = vmatmul.mubr.f32.gmra.mxu0 %v19_v35 }
  0x27   :  { %160 = vmatprep.mubr.f32.mxu0 %v22_v36 }
  0x2a   :  { %161 = vmatmul.mubr.f32.gmra.mxu0 %v21_v37 }
  0x2b   :  { %165 = vmatprep.mubr.f32.mxu0 %v24_v38 }
  0x2e   :  { %166 = vmatmul.mubr.f32.gmra.mxu0 %v23_v39 }
  0x2f   :  { %170 = vmatprep.mubr.f32.mxu0 %v26_v40 }
  0x32   :  { %171 = vmatmul.mubr.f32.gmra.mxu0 %v25_v41 }
  0x33   :  { %175 = vmatprep.mubr.f32.mxu0 %v28_v42 }
  0x36   :  { %176 = vmatmul.mubr.f32.gmra.mxu0 %v27_v43 }
  0x37   :  { %180 = vmatprep.mubr.f32.mxu0 %v30_v44 }
  0x3a   :  { %181 = vmatmul.mubr.f32.gmra.mxu0 %v29_v45 }
  0x3b   :  { %185 = vmatprep.mubr.f32.mxu0 %v32_v46 }
  0x3e   :  { %186 = vmatmul.mubr.f32.gmra.mxu0 %v31_v47 }
  0x3f   :  { %190 = vmatprep.mubr.f32.mxu0 %v34_v48 }
  0x42   :  { %191 = vmatmul.mubr.f32.gmra.mxu0 %v33_v49 }
  0x43   :  { %195 = vmatprep.mubr.f32.mxu0 %v36_v50 }
  0x46   :  { %196 = vmatmul.mubr.f32.gmra.mxu0 %v35_v51 }
  0x47   :  { %200 = vmatprep.mubr.f32.mxu0 %v38_v52 }
  0x4a   :  { %201 = vmatmul.mubr.f32.gmra.mxu0 %v37_v53 }
  0x4b   :  { %205 = vmatprep.mubr.f32.mxu0 %v40_v54 }
  0x4e   :  { %206 = vmatmul.mubr.f32.gmra.mxu0 %v39_v55 }
  0x4f   :  { %210 = vmatprep.mubr.f32.mxu0 %v42_v56 }
  0x52   :  { %211 = vmatmul.mubr.f32.gmra.mxu0 %v41_v57 }
  0x53   :  { %215 = vmatprep.mubr.f32.mxu0 %v44_v58 }
  0x56   :  { %216 = vmatmul.mubr.f32.gmra.mxu0 %v43_v59 }
  0x57   :  { %220 = vmatprep.mubr.f32.mxu0 %v46_v60 }
  0x5a   :  { %221 = vmatmul.mubr.f32.gmra.mxu0 %v45_v61 }
  0x5b   :  { %225 = vmatprep.mubr.f32.mxu0 %v48_v62 }
  0x5e   :  { %226 = vmatmul.mubr.f32.gmra.mxu0 %v47_v63 }
  0xe2   :  { %v1387_v0 = vpop.f32.mrf.mxu0 }
  0xe4   :  { %v1388_v2 = vpop.f32.mrf.mxu0 }
  0xe5   :  { %v1389_v3 = vadd.f32 %v1388_v2, %v1387_v0 }
  0xe6   :  { %v1390_v4 = vpop.f32.mrf.mxu0 }
  0xe7   :  { %v2020_v5 = vadd.f32 %v1389_v3, %v2017_v1 }
  0xe8   :  { %v1391_v6 = vpop.f32.mrf.mxu0 }
  0xe9   :  { %v1392_v7 = vadd.f32 %v1391_v6, %v1390_v4 }
  0xea   :  { %v1393_v8 = vpop.f32.mrf.mxu0 }
  0xeb   :  { %v2023_v9 = vadd.f32 %v1392_v7, %v2017_v1 }
  0xec   :  { %v1394_v10 = vpop.f32.mrf.mxu0 }
  0xed   :  { %v1395_v27 = vadd.f32 %v1394_v10, %v1393_v8 }
  0xee   :  { %v1396_v11 = vpop.f32.mrf.mxu0 }
  0xef   :  { %v163_v32 = vadd.f32 %v1395_v27, %v2017_v1  ;;  %v463_v27 = vld [vmem:[%s2728_s3 + $0x170] sm:$0xff] }
  0xf0   :  { %v1397_v12 = vpop.f32.mrf.mxu0 }
  0xf1   :  { %v233_v38 = vmax.f32 %v163_v32, 0.0  ;;  %v1398_v58 = vadd.f32 %v1397_v12, %v1396_v11  ;;  %v461_v32 = vld [vmem:[%s2728_s3 + $0x160] sm:$0xff] }
  0xf2   :  { %v1399_v13 = vpop.f32.mrf.mxu0 }
  0xf3   :  { %v168_v6 = vadd.f32 %v1398_v58, %v2017_v1  ;;  %v231_v58 = vmax.f32 %v2020_v5, 0.0 }
  0xf4   :  { %v1400_v14 = vpop.f32.mrf.mxu0 }
  0xf5   :  { %v1401_v36 = vadd.f32 %v1400_v14, %v1399_v13 }
  0xf6   :  { %v1402_v15 = vpop.f32.mrf.mxu0 }
  0xf7   :  { %v173_v42 = vadd.f32 %v1401_v36, %v2017_v1  ;;  %v459_v36 = vld [vmem:[%s2728_s3 + $0x150] sm:$0xff] }
  0xf8   :  { %v1403_v16 = vpop.f32.mrf.mxu0 }
  0xf9   :  { %v1404_v44 = vadd.f32 %v1403_v16, %v1402_v15  ;;  %v235_v48 = vmax.f32 %v173_v42, 0.0  ;;  %v234_v16 = vmax.f32 %v168_v6, 0.0  ;;  %v456_v42 = vld [vmem:[%s2728_s3 + $0x138] sm:$0xff] }
  0xfa   :  { %v1405_v17 = vpop.f32.mrf.mxu0 }
  0xfb   :  { %v178_v50 = vadd.f32 %v1404_v44, %v2017_v1  ;;  %v455_v44 = vld [vmem:[%s2728_s3 + $0x130] sm:$0xff] }
  0xfc   :  { %v1406_v18 = vpop.f32.mrf.mxu0 }
  0xfd   :  { %v1407_v51 = vadd.f32 %v1406_v18, %v1405_v17  ;;  %v236_v60 = vmax.f32 %v178_v50, 0.0 }
  0xfe   :  { %v1408_v19 = vpop.f32.mrf.mxu0 }
  0xff   :  { %v183_v61 = vadd.f32 %v1407_v51, %v2017_v1 }
 0x100   :  { %v1409_v20 = vpop.f32.mrf.mxu0 }
 0x101   :  { %v237_v8 = vmax.f32 %v183_v61, 0.0  ;;  %v1410_v10 = vadd.f32 %v1409_v20, %v1408_v19  ;;  %v481_v19 = vld [vmem:[%s2728_s3 + $0x200] sm:$0xff] }
 0x102   :  { %v1411_v21 = vpop.f32.mrf.mxu0  ;;  %v465_v20 = vld [vmem:[%s2728_s3 + $0x180] sm:$0xff]  ;;  %1435 = vmatprep.subr.mxu1 %v481_v19 }
 0x103   :  { %v188_v17 = vadd.f32 %v1410_v10, %v2017_v1  ;;  %1436 = vmatpush3.msra.mxu1 %v465_v20 }
 0x104   :  { %v1412_v22 = vpop.f32.mrf.mxu0 }
 0x105   :  { %v1413_v23 = vadd.f32 %v1412_v22, %v1411_v21  ;;  %v238_v22 = vmax.f32 %v188_v17, 0.0 }
 0x106   :  { %v1414_v24 = vpop.f32.mrf.mxu0 }
 0x107   :  { %v2026_v25 = vadd.f32 %v1413_v23, %v2017_v1 }
 0x108   :  { %v1415_v26 = vpop.f32.mrf.mxu0 }
 0x109   :  { %v1416_v28 = vadd.f32 %v1415_v26, %v1414_v24  ;;  %v464_v24 = vld [vmem:[%s2728_s3 + $0x178] sm:$0xff]  ;;  %v479_v26 = vld [vmem:[%s2728_s3 + $0x1f0] sm:$0xff] }
 0x10a   :  { %v1417_v29 = vpop.f32.mrf.mxu0 }
 0x10b   :  { %v2029_v30 = vadd.f32 %v1416_v28, %v2017_v1  ;;  %v478_v28 = vld [vmem:[%s2728_s3 + $0x1e8] sm:$0xff] }
 0x10c   :  { %v1418_v31 = vpop.f32.mrf.mxu0 }
 0x10d   :  { %v1419_v33 = vadd.f32 %v1418_v31, %v1417_v29  ;;  %v462_v29 = vld [vmem:[%s2728_s3 + $0x168] sm:$0xff]  ;;  %v477_v31 = vld [vmem:[%s2728_s3 + $0x1e0] sm:$0xff] }
 0x10e   :  { %v1420_v34 = vpop.f32.mrf.mxu0 }
 0x10f   :  { %v203_v35 = vadd.f32 %v1419_v33, %v2017_v1  ;;  %v476_v33 = vld [vmem:[%s2728_s3 + $0x1d8] sm:$0xff] }
 0x110   :  { %v1421_v37 = vpop.f32.mrf.mxu0 }
 0x111   :  { %v241_v39 = vmax.f32 %v203_v35, 0.0  ;;  %v1422_v55 = vadd.f32 %v1421_v37, %v1420_v34  ;;  %v460_v34 = vld [vmem:[%s2728_s3 + $0x158] sm:$0xff]  ;;  %v475_v35 = vld [vmem:[%s2728_s3 + $0x1d0] sm:$0xff]  ;;  %v474_v37 = vld [vmem:[%s2728_s3 + $0x1c8] sm:$0xff] }
 0x112   :  { %v1423_v40 = vpop.f32.mrf.mxu0 }
 0x113   :  { %v1696_v41 = vpack.i.bf16 %v241_v39, %v233_v38  ;;  %v208_v2 = vadd.f32 %v1422_v55, %v2017_v1  ;;  %v458_v38 = vld [vmem:[%s2728_s3 + $0x148] sm:$0xff]  ;;  %v473_v39 = vld [vmem:[%s2728_s3 + $0x1c0] sm:$0xff]  ;;  %v468_v55 = vld [vmem:[%s2728_s3 + $0x198] sm:$0xff] }
 0x114   :  { %v1424_v43 = vpop.f32.mrf.mxu0 }
 0x115   :  { %v1425_v45 = vadd.f32 %v1424_v43, %v1423_v40  ;;  %1697 = vrot.lane.b32.xlu0 %v1696_v41, %s1788_s0  ;;  %v242_v13 = vmax.f32 %v208_v2, 0.0  ;;  %v457_v40 = vld [vmem:[%s2728_s3 + $0x140] sm:$0xff]  ;;  %v472_v41 = vld [vmem:[%s2728_s3 + $0x1b8] sm:$0xff]  ;;  %v471_v43 = vld [vmem:[%s2728_s3 + $0x1b0] sm:$0xff] }
 0x116   :  { %v1426_v46 = vpop.f32.mrf.mxu0 }
 0x117   :  { %v213_v47 = vadd.f32 %v1425_v45, %v2017_v1  ;;  %v1711_v21 = vpack.i.bf16 %v242_v13, %v234_v16  ;;  %v513_v13 = vld [vmem:[%s2728_s3 + $0x300] sm:$0xff] }
 0x118   :  { %v1427_v49 = vpop.f32.mrf.mxu0 }
 0x119   :  { %v243_v52 = vmax.f32 %v213_v47, 0.0  ;;  %v1428_v53 = vadd.f32 %v1427_v49, %v1426_v46  ;;  %v470_v46 = vld [vmem:[%s2728_s3 + $0x1a8] sm:$0xff]  ;;  %v469_v49 = vld [vmem:[%s2728_s3 + $0x1a0] sm:$0xff] }
 0x11a   :  { %v1429_v54 = vpop.f32.mrf.mxu0 }
 0x11b   :  { %v218_v56 = vadd.f32 %v1428_v53, %v2017_v1  ;;  %v1701_v57 = vpack.i.bf16 %v243_v52, %v235_v48  ;;  %v454_v48 = vld [vmem:[%s2728_s3 + $0x128] sm:$0xff]  ;;  %v453_v52 = vld [vmem:[%s2728_s3 + $0x120] sm:$0xff] }
 0x11c   :  { %v1430_v59 = vpop.f32.mrf.mxu0 }
 0x11d   :  { %v244_v62 = vmax.f32 %v218_v56, 0.0  ;;  %v1431_v63 = vadd.f32 %v1430_v59, %v1429_v54  ;;  %1702 = vrot.lane.b32.xlu0 %v1701_v57, %s1789_s15  ;;  %v452_v56 = vld [vmem:[%s2728_s3 + $0x118] sm:$0xff]  ;;  %v467_v57 = vld [vmem:[%s2728_s3 + $0x190] sm:$0xff]  ;;  %v239_v59 = vmax.f32 %v2026_v25, 0.0 }
 0x11e   :  { %v1432_v0 = vpop.f32.mrf.mxu0 }
 0x11f   :  { %v223_v3 = vadd.f32 %v1431_v63, %v2017_v1  ;;  %v1716_v4 = vpack.i.bf16 %v244_v62, %v236_v60  ;;  %v451_v60 = vld [vmem:[%s2728_s3 + $0x110] sm:$0xff] }
 0x120   :  { %v1433_v7 = vpop.f32.mrf.mxu0 }
 0x121   :  { %v245_v11 = vmax.f32 %v223_v3, 0.0  ;;  %v1434_v12 = vadd.f32 %v1433_v7, %v1432_v0  ;;  %1717 = vrot.lane.b32.xlu0 %v1716_v4, %s1789_s15  ;;  %v466_v3 = vld [vmem:[%s2728_s3 + $0x188] sm:$0xff] }
 0x122   :  { %v450_v7 = vld [vmem:[%s2728_s3 + $0x108] sm:$0xff] }
 0x123   :  { %v228_v14 = vadd.f32 %v1434_v12, %v2017_v1  ;;  %v1706_v15 = vpack.i.bf16 %v245_v11, %v237_v8  ;;  %v480_v1 = vld [vmem:[%s2728_s3 + $0x1f8] sm:$0xff] }
 0x124   :  { %1437 = vmatprep.subr.mxu1 %v480_v1 }
 0x125   :  { %1707 = vrot.lane.b32.xlu1 %v1706_v15, %s1790_s16  ;;  %v246_v18 = vmax.f32 %v228_v14, 0.0  ;;  %1438 = vmatpush3.msra.mxu1 %v464_v24  ;;  %v232_v14 = vmax.f32 %v2023_v9, 0.0  ;;  %v240_v15 = vmax.f32 %v2029_v30, 0.0 }
 0x126   :  { %1439 = vmatprep.subr.mxu1 %v479_v26 }
 0x127   :  { %v1721_v23 = vpack.i.bf16 %v246_v18, %v238_v22  ;;  %1440 = vmatpush3.msra.mxu1 %v463_v27 }
 0x128   :  { %1441 = vmatprep.subr.mxu1 %v478_v28 }
 0x129   :  { %1712 = vrot.lane.b32.xlu1 %v1711_v21, %s1788_s0  ;;  %1442 = vmatpush3.msra.mxu1 %v462_v29 }
 0x12a   :  { %1443 = vmatprep.subr.mxu1 %v477_v31 }
 0x12b   :  { %1444 = vmatpush3.msra.mxu1 %v461_v32 }
 0x12c   :  { %1445 = vmatprep.subr.mxu1 %v476_v33 }
 0x12d   :  { %1722 = vrot.lane.b32.xlu1 %v1721_v23, %s1790_s16  ;;  %1446 = vmatpush3.msra.mxu1 %v460_v34  ;;  %s1796_s16 = smov 19  }
 0x12e   :  { %1447 = vmatprep.subr.mxu1 %v475_v35 }
 0x12f   :  { %1448 = vmatpush3.msra.mxu1 %v459_v36 }
 0x130   :  { %1449 = vmatprep.subr.mxu1 %v474_v37 }
 0x131   :  { %1450 = vmatpush3.msra.mxu1 %v458_v38 }
 0x132   :  { %1451 = vmatprep.subr.mxu1 %v473_v39 }
 0x133   :  { %1452 = vmatpush3.msra.mxu1 %v457_v40 }
 0x134   :  { %1453 = vmatprep.subr.mxu1 %v472_v41 }
 0x135   :  { %1454 = vmatpush3.msra.mxu1 %v456_v42 }
 0x136   :  { %1455 = vmatprep.subr.mxu1 %v471_v43 }
 0x137   :  { %1456 = vmatpush3.msra.mxu1 %v455_v44 }
 0x138   :  { %1457 = vmatprep.subr.mxu1 %v470_v46 }
 0x139   :  { %1458 = vmatpush3.msra.mxu1 %v454_v48 }
 0x13a   :  { %1459 = vmatprep.subr.mxu1 %v469_v49 }
 0x13b   :  { %1460 = vmatpush3.msra.mxu1 %v453_v52 }
 0x13c   :  { %1461 = vmatprep.subr.mxu1 %v468_v55 }
 0x13d   :  { %1462 = vmatpush3.msra.mxu1 %v452_v56 }
 0x13e   :  { %1463 = vmatprep.subr.mxu1 %v467_v57 }
 0x13f   :  { %1464 = vmatpush3.msra.mxu1 %v451_v60 }
 0x140   :  { %1465 = vmatprep.subr.mxu1 %v466_v3 }
 0x141   :  { %1466 = vmatpush3.msra.mxu1 %v450_v7  ;;  %v497_v7 = vld [vmem:[%s2728_s3 + $0x280] sm:$0xff] }
 0x142   :  { %1476 = vmatprep.subr.mxu1 %v513_v13 }
 0x187   :  { %v1698_v45 = vpop.permute.xlu0 %1697 }
 0x188   :  { %v1700_v50 = vunpack.i.h.bf16 %v1698_v45  ;;  %v1699_v51 = vunpack.i.l.bf16 %v1698_v45 }
 0x18a   :  { %v304_v62 = vsel %vm295_vm0, %v239_v59, %v1700_v50  ;;  %v296_v63 = vsel %vm295_vm0, %v231_v58, %v1699_v51 }
 0x18f   :  { %v1703_v47 = vpop.permute.xlu0 %1702 }
 0x190   :  { %v1705_v53 = vunpack.i.h.bf16 %v1703_v47  ;;  %v1704_v54 = vunpack.i.l.bf16 %v1703_v47 }
 0x192   :  { %v299_v5 = vsel %vm298_vm1, %v296_v63, %v1704_v54  ;;  %v306_v25 = vsel %vm298_vm1, %v304_v62, %v1705_v53 }
 0x193   :  { %v1718_v16 = vpop.permute.xlu0 %1717 }
 0x194   :  { %v1720_v19 = vunpack.i.h.bf16 %v1718_v16  ;;  %v1719_v20 = vunpack.i.l.bf16 %v1718_v16  ;;  %v496_v16 = vld [vmem:[%s2728_s3 + $0x278] sm:$0xff] }
 0x197   :  { %v1708_v61 = vpop.permute.xlu1 %1707 }
 0x198   :  { %v1710_v0 = vunpack.i.h.bf16 %v1708_v61  ;;  %v1709_v2 = vunpack.i.l.bf16 %v1708_v61 }
 0x19a   :  { %v2147_v4 = vsel %vm301_vm2, %v299_v5, %v1709_v2  ;;  %v2150_v6 = vsel %vm301_vm2, %v306_v25, %v1710_v0 }
 0x19b   :  { %v2156_v8 = vrot.slane %v2150_v6, 2  ;;  %v1713_v10 = vpop.permute.xlu1 %1712  ;;  %v1731_v11 = vpack.i.bf16 %v2150_v6, %v2147_v4  ;;  %v2161_v12 = vrot.slane %v2147_v4, 2  ;;  %v313_v29 = vrot.slane %v2147_v4, 4 }
 0x19c   :  { %v1715_v17 = vunpack.i.h.bf16 %v1713_v10  ;;  %v1714_v18 = vunpack.i.l.bf16 %v1713_v10  ;;  %v2184_v34 = vrot.slane %v2150_v6, 4  ;;  %v2190_v36 = vrot.slane %v2147_v4, 6 }
 0x19d   :  { %1732 = vrot.lane.b32.xlu1 %v1731_v11, %s1789_s15  ;;  %v1726_v21 = vpack.i.bf16 %v2156_v8, %v2161_v12  ;;  %v335_v37 = vrot.slane %v2150_v6, 6  ;;  %v380_v57 = vrot.slane %v2156_v8, 4  ;;  %v387_v60 = vrot.slane %v2161_v12, 6 }
 0x19e   :  { %v305_v22 = vsel %vm295_vm0, %v240_v15, %v1715_v17  ;;  %v297_v23 = vsel %vm295_vm0, %v232_v14, %v1714_v18  ;;  %v1751_v39 = vpack.i.bf16 %v2184_v34, %v313_v29  ;;  %v401_v10 = vrot.slane %v2156_v8, 2  ;;  %v512_v15 = vld [vmem:[%s2728_s3 + $0x2f8] sm:$0xff] }
 0x19f   :  { %v1723_v1 = vpop.permute.xlu1 %1722  ;;  %1727 = vrot.lane.b32.xlu0 %v1726_v21, %s1789_s15  ;;  %v300_v24 = vsel %vm298_vm1, %v297_v23, %v1719_v20  ;;  %v307_v26 = vsel %vm298_vm1, %v305_v22, %v1720_v19  ;;  %v1746_v41 = vpack.i.bf16 %v335_v37, %v2190_v36  ;;  %v511_v22 = vld [vmem:[%s2728_s3 + $0x2f0] sm:$0xff] }
 0x1a0   :  { %v1725_v9 = vunpack.i.h.bf16 %v1723_v1  ;;  %v1724_v30 = vunpack.i.l.bf16 %v1723_v1  ;;  %v495_v1 = vld [vmem:[%s2728_s3 + $0x270] sm:$0xff] }
 0x1a2   :  { %v303_v27 = vsel %vm301_vm2, %v300_v24, %v1724_v30  ;;  %v2178_v28 = vsel %vm301_vm2, %v307_v26, %v1725_v9 }
 0x1a3   :  { %v1741_v31 = vpack.i.bf16 %v2178_v28, %v303_v27  ;;  %v357_v32 = vrot.slane %v303_v27, 2  ;;  %v363_v33 = vrot.slane %v2178_v28, 2  ;;  %v2193_v38 = vrot.slane %v303_v27, 4 }
 0x1a4   :  { %v2200_v40 = vrot.slane %v2178_v28, 4  ;;  %v2206_v42 = vrot.slane %v303_v27, 6  ;;  %v2209_v43 = vrot.slane %v2178_v28, 6  ;;  %v510_v27 = vld [vmem:[%s2728_s3 + $0x2e8] sm:$0xff] }
 0x1a5   :  { %1742 = vrot.lane.b32.xlu1 %v1741_v31, %s1789_s15  ;;  %v1736_v35 = vpack.i.bf16 %v363_v33, %v357_v32  ;;  %v408_v18 = vrot.slane %v357_v32, 4  ;;  %v494_v32 = vld [vmem:[%s2728_s3 + $0x268] sm:$0xff] }
 0x1a6   :  { %v1761_v44 = vpack.i.bf16 %v2200_v40, %v2193_v38  ;;  %v1756_v45 = vpack.i.bf16 %v2209_v43, %v2206_v42 }
 0x1a7   :  { %1737 = vrot.lane.b32.xlu0 %v1736_v35, %s1789_s15 }
 0x1a9   :  { %1752 = vrot.lane.b32.xlu1 %v1751_v39, %s1789_s15 }
 0x1ab   :  { %1747 = vrot.lane.b32.xlu0 %v1746_v41, %s1789_s15  ;;  %v509_v41 = vld [vmem:[%s2728_s3 + $0x2e0] sm:$0xff] }
 0x1ad   :  { %1762 = vrot.lane.b32.xlu1 %v1761_v44, %s1789_s15 }
 0x1af   :  { %1757 = vrot.lane.b32.xlu0 %v1756_v45, %s1789_s15  ;;  %v493_v45 = vld [vmem:[%s2728_s3 + $0x260] sm:$0xff] }
 0x20f   :  { %v1733_v46 = vpop.permute.xlu1 %1732 }
 0x210   :  { %v1735_v47 = vunpack.i.h.bf16 %v1733_v46  ;;  %v1734_v48 = vunpack.i.l.bf16 %v1733_v46  ;;  %v382_v46 = vrot.slane %v335_v37, 4 }
 0x211   :  { %v1728_v49 = vpop.permute.xlu0 %1727 }
 0x212   :  { %v322_v50 = vsel %vm298_vm1, %v1734_v48, %v1735_v47  ;;  %v1730_v51 = vunpack.i.h.bf16 %v1728_v49  ;;  %v1729_v52 = vunpack.i.l.bf16 %v1728_v49  ;;  %v508_v47 = vld [vmem:[%s2728_s3 + $0x2d8] sm:$0xff]  ;;  %v389_v49 = vrot.slane %v2206_v42, 6 }
 0x213   :  { %v372_v53 = vrot.slane %v322_v50, 6  ;;  %v393_v63 = vrot.slane %v322_v50, 4  ;;  %v492_v48 = vld [vmem:[%s2728_s3 + $0x258] sm:$0xff] }
 0x214   :  { %v328_v54 = vsel %vm298_vm1, %v1729_v52, %v1730_v51  ;;  %v491_v52 = vld [vmem:[%s2728_s3 + $0x250] sm:$0xff] }
 0x215   :  { %v373_v55 = vrot.slane %v328_v54, 6  ;;  %v424_v56 = vsel %vm423_vm3, %v2147_v4, %v372_v53  ;;  %v394_v58 = vrot.slane %v328_v54, 4  ;;  %v438_v19 = vsel %vm423_vm3, %v393_v63, %v2156_v8  ;;  %v490_v54 = vld [vmem:[%s2728_s3 + $0x248] sm:$0xff]  ;;  %v503_v63 = vld [vmem:[%s2728_s3 + $0x2b0] sm:$0xff] }
 0x216   :  { %v429_v62 = vsel %vm428_vm4, %v424_v56, %v2184_v34  ;;  %v442_v8 = vsel %vm428_vm4, %v438_v19, %v2193_v38  ;;  %v483_v19 = vld [vmem:[%s2728_s3 + $0x210] sm:$0xff]  ;;  %v402_v4 = vrot.slane %v2200_v40, 2 }
 0x217   :  { %v1743_v59 = vpop.permute.xlu1 %1742  ;;  %v425_v61 = vsel %vm423_vm3, %v2161_v12, %v373_v55  ;;  %v434_v14 = vsel %vm433_vm5, %v429_v62, %v2190_v36  ;;  %v439_v17 = vsel %vm423_vm3, %v394_v58, %v401_v10  ;;  %v488_v62 = vld [vmem:[%s2728_s3 + $0x238] sm:$0xff]  ;;  %v486_v10 = vld [vmem:[%s2728_s3 + $0x228] sm:$0xff] }
 0x218   :  { %v1745_v0 = vunpack.i.h.bf16 %v1743_v59  ;;  %v1744_v2 = vunpack.i.l.bf16 %v1743_v59  ;;  %v430_v5 = vsel %vm428_vm4, %v425_v61, %v380_v57  ;;  %v443_v26 = vsel %vm428_vm4, %v439_v17, %v408_v18  ;;  %v489_v57 = vld [vmem:[%s2728_s3 + $0x240] sm:$0xff]  ;;  %v504_v61 = vld [vmem:[%s2728_s3 + $0x2b8] sm:$0xff] }
 0x219   :  { %v1738_v25 = vpop.permute.xlu0 %1737  ;;  %v435_v3 = vsel %vm433_vm5, %v430_v5, %v387_v60  ;;  %v484_v17 = vld [vmem:[%s2728_s3 + $0x218] sm:$0xff]  ;;  %v403_v18 = vrot.slane %v2209_v43, 2 }
 0x21a   :  { %v362_v11 = vsel %vm298_vm1, %v1744_v2, %v1745_v0  ;;  %v1740_v12 = vunpack.i.h.bf16 %v1738_v25  ;;  %v1739_v13 = vunpack.i.l.bf16 %v1738_v25  ;;  %583 = vmatprep.mubr.f32.mxu1 %v435_v3  ;;  %v487_v25 = vld [vmem:[%s2728_s3 + $0x230] sm:$0xff] }
 0x21b   :  { %584 = vmatmul.mubr.f32.vlgmr.msra.gmra.mxu1 %v434_v14  ;;  %v415_v23 = vrot.slane %v362_v11, 2  ;;  %v1753_v6 = vpop.permute.xlu1 %1752 }
 0x21c   :  { %v368_v21 = vsel %vm298_vm1, %v1739_v13, %v1740_v12  ;;  %1477 = vmatpush3.msra.mxu1 %v497_v7  ;;  %v1755_v55 = vunpack.i.h.bf16 %v1753_v6  ;;  %v1754_v56 = vunpack.i.l.bf16 %v1753_v6  ;;  %v502_v7 = vld [vmem:[%s2728_s3 + $0x2a8] sm:$0xff]  ;;  %v501_v12 = vld [vmem:[%s2728_s3 + $0x2a0] sm:$0xff] }
 0x21d   :  { %1478 = vmatprep.subr.mxu1 %v512_v15  ;;  %v1748_v20 = vpop.permute.xlu0 %1747  ;;  %v416_v9 = vrot.slane %v368_v21, 2  ;;  %v446_v39 = vsel %vm433_vm5, %v442_v8, %v415_v23  ;;  %v485_v15 = vld [vmem:[%s2728_s3 + $0x220] sm:$0xff]  ;;  %v719_v6 = vld [vmem:[%s2728_s3 + $0x368] sm:$0xff] }
 0x21e   :  { %v1750_v30 = vunpack.i.h.bf16 %v1748_v20  ;;  %v1749_v24 = vunpack.i.l.bf16 %v1748_v20  ;;  %1479 = vmatpush3.msra.mxu1 %v496_v16  ;;  %v334_v0 = vsel %vm298_vm1, %v1754_v56, %v1755_v55  ;;  %v500_v16 = vld [vmem:[%s2728_s3 + $0x298] sm:$0xff]  ;;  %v381_v20 = vrot.slane %v2184_v34, 4  ;;  %v768_v55 = vld [vmem:[%s2728_s3 + $0x4f0] sm:$0xff] }
 0x21f   :  { %1480 = vmatprep.subr.mxu1 %v511_v22  ;;  %v447_v31 = vsel %vm433_vm5, %v443_v26, %v416_v9  ;;  %v1763_v58 = vpop.permute.xlu1 %1762  ;;  %v374_v11 = vrot.slane %v334_v0, 6  ;;  %v499_v22 = vld [vmem:[%s2728_s3 + $0x290] sm:$0xff]  ;;  %v498_v9 = vld [vmem:[%s2728_s3 + $0x288] sm:$0xff]  ;;  %v388_v34 = vrot.slane %v2193_v38, 6  ;;  %v717_v56 = vld [vmem:[%s2728_s3 + $0x358] sm:$0xff] }
 0x220   :  { %v340_v35 = vsel %vm298_vm1, %v1749_v24, %v1750_v30  ;;  %1481 = vmatpush3.msra.mxu1 %v495_v1  ;;  %588 = vmatprep.mubr.f32.mxu1 %v447_v31  ;;  %v1765_v2 = vunpack.i.h.bf16 %v1763_v58  ;;  %v1764_v5 = vunpack.i.l.bf16 %v1763_v58  ;;  %v410_v30 = vrot.slane %v2206_v42, 4  ;;  %v732_v58 = vld [vmem:[%s2728_s3 + $0x3d0] sm:$0xff]  ;;  %v715_v0 = vld [vmem:[%s2728_s3 + $0x348] sm:$0xff] }
 0x221   :  { %v375_v44 = vrot.slane %v340_v35, 6  ;;  %1482 = vmatprep.subr.mxu1 %v510_v27  ;;  %589 = vmatmul.mubr.f32.gmra.mxu1 %v446_v39  ;;  %v1758_v53 = vpop.permute.xlu0 %1757  ;;  %v426_v23 = vsel %vm423_vm3, %v313_v29, %v374_v11  ;;  %v482_v29 = vld [vmem:[%s2728_s3 + $0x208] sm:$0xff]  ;;  %v409_v42 = vrot.slane %v2193_v38, 4  ;;  %v764_v11 = vld [vmem:[%s2728_s3 + $0x4d0] sm:$0xff] }
 0x222   :  { %1483 = vmatpush3.msra.mxu1 %v494_v32  ;;  %593 = vmatprep.mubr.f32.mxu1 %v363_v33  ;;  %v507_v33 = vld [vmem:[%s2728_s3 + $0x2d0] sm:$0xff]  ;;  %v1760_v59 = vunpack.i.h.bf16 %v1758_v53  ;;  %v1759_v60 = vunpack.i.l.bf16 %v1758_v53  ;;  %v350_v13 = vsel %vm298_vm1, %v1764_v5, %v1765_v2  ;;  %v431_v24 = vsel %vm428_vm4, %v426_v23, %v381_v20  ;;  %v739_v38 = vld [vmem:[%s2728_s3 + $0x408] sm:$0xff]  ;;  %v718_v53 = vld [vmem:[%s2728_s3 + $0x360] sm:$0xff] }
 0x223   :  { %1484 = vmatprep.subr.mxu1 %v509_v41  ;;  %v427_v50 = vsel %vm423_vm3, %v2190_v36, %v375_v44  ;;  %v506_v36 = vld [vmem:[%s2728_s3 + $0x2c8] sm:$0xff]  ;;  %v395_v21 = vrot.slane %v350_v13, 4  ;;  %v436_v8 = vsel %vm433_vm5, %v431_v24, %v388_v34  ;;  %v417_v39 = vrot.slane %v350_v13, 2  ;;  %1517 = vmatprep.subr.mxu0 %v739_v38  ;;  %v750_v2 = vld [vmem:[%s2728_s3 + $0x460] sm:$0xff]  ;;  %v748_v13 = vld [vmem:[%s2728_s3 + $0x450] sm:$0xff] }
 0x224   :  { %1485 = vmatpush3.msra.mxu1 %v493_v45  ;;  %v432_v37 = vsel %vm428_vm4, %v427_v50, %v382_v46  ;;  %v356_v3 = vsel %vm298_vm1, %v1759_v60, %v1760_v59  ;;  %v723_v44 = vld [vmem:[%s2728_s3 + $0x388] sm:$0xff]  ;;  %v738_v45 = vld [vmem:[%s2728_s3 + $0x400] sm:$0xff]  ;;  %v716_v60 = vld [vmem:[%s2728_s3 + $0x350] sm:$0xff] }
 0x225   :  { %1486 = vmatprep.subr.mxu1 %v508_v47  ;;  %594 = vmatmul.mubr.f32.gmra.mxu1 %v2178_v28  ;;  %v437_v51 = vsel %vm433_vm5, %v432_v37, %v389_v49  ;;  %v505_v28 = vld [vmem:[%s2728_s3 + $0x2c0] sm:$0xff]  ;;  %v396_v14 = vrot.slane %v356_v3, 4  ;;  %v440_v27 = vsel %vm423_vm3, %v395_v21, %v402_v4  ;;  %v418_v31 = vrot.slane %v356_v3, 2  ;;  %v736_v47 = vld [vmem:[%s2728_s3 + $0x3f0] sm:$0xff]  ;;  %v735_v49 = vld [vmem:[%s2728_s3 + $0x3e8] sm:$0xff] }
 0x226   :  { %1487 = vmatpush3.msra.mxu1 %v492_v48  ;;  %663 = vmatprep.mubr.f32.mxu1 %v437_v51  ;;  %v444_v35 = vsel %vm428_vm4, %v440_v27, %v409_v42  ;;  %v722_v46 = vld [vmem:[%s2728_s3 + $0x380] sm:$0xff]  ;;  %v720_v48 = vld [vmem:[%s2728_s3 + $0x370] sm:$0xff]  ;;  %v771_v50 = vld [vmem:[%s2728_s3 + $0x508] sm:$0xff] }
 0x227   :  { %1488 = vmatprep.subr.mxu1 %v507_v33  ;;  %v441_v1 = vsel %vm423_vm3, %v396_v14, %v403_v18  ;;  %v448_v41 = vsel %vm433_vm5, %v444_v35, %v417_v39  ;;  %1518 = vmatpush3.msra.mxu0 %v723_v44  ;;  %v755_v33 = vld [vmem:[%s2728_s3 + $0x488] sm:$0xff]  ;;  %v770_v37 = vld [vmem:[%s2728_s3 + $0x500] sm:$0xff]  ;;  %v728_v14 = vld [vmem:[%s2728_s3 + $0x3b0] sm:$0xff] }
 0x228   :  { %1489 = vmatpush3.msra.mxu1 %v491_v52  ;;  %v445_v26 = vsel %vm428_vm4, %v441_v1, %v410_v30  ;;  %1519 = vmatprep.subr.mxu0 %v738_v45  ;;  %v734_v51 = vld [vmem:[%s2728_s3 + $0x3e0] sm:$0xff]  ;;  %v767_v59 = vld [vmem:[%s2728_s3 + $0x4e8] sm:$0xff]  ;;  %v761_v20 = vld [vmem:[%s2728_s3 + $0x4b8] sm:$0xff] }
 0x229   :  { %1490 = vmatprep.subr.mxu1 %v506_v36  ;;  %v449_v32 = vsel %vm433_vm5, %v445_v26, %v418_v31  ;;  %1520 = vmatpush3.msra.mxu0 %v722_v46  ;;  %v754_v52 = vld [vmem:[%s2728_s3 + $0x480] sm:$0xff]  ;;  %v769_v36 = vld [vmem:[%s2728_s3 + $0x4f8] sm:$0xff]  ;;  %v727_v18 = vld [vmem:[%s2728_s3 + $0x3a8] sm:$0xff] }
 0x22a   :  { %1491 = vmatpush3.msra.mxu1 %v490_v54  ;;  %v753_v54 = vld [vmem:[%s2728_s3 + $0x478] sm:$0xff]  ;;  %v730_v5 = vld [vmem:[%s2728_s3 + $0x3c0] sm:$0xff]  ;;  %v760_v4 = vld [vmem:[%s2728_s3 + $0x4b0] sm:$0xff] }
 0x22b   :  { %1492 = vmatprep.subr.mxu1 %v505_v28  ;;  %v733_v28 = vld [vmem:[%s2728_s3 + $0x3d8] sm:$0xff]  ;;  %v714_v3 = vld [vmem:[%s2728_s3 + $0x340] sm:$0xff]  ;;  %v744_v24 = vld [vmem:[%s2728_s3 + $0x430] sm:$0xff] }
 0x22c   :  { %1493 = vmatpush3.msra.mxu1 %v489_v57  ;;  %v752_v57 = vld [vmem:[%s2728_s3 + $0x470] sm:$0xff]  ;;  %v762_v21 = vld [vmem:[%s2728_s3 + $0x4c0] sm:$0xff]  ;;  %v725_v30 = vld [vmem:[%s2728_s3 + $0x398] sm:$0xff] }
 0x22d   :  { %1494 = vmatprep.subr.mxu1 %v504_v61  ;;  %v751_v61 = vld [vmem:[%s2728_s3 + $0x468] sm:$0xff]  ;;  %v746_v23 = vld [vmem:[%s2728_s3 + $0x440] sm:$0xff]  ;;  %v724_v34 = vld [vmem:[%s2728_s3 + $0x390] sm:$0xff] }
 0x22e   :  { %1495 = vmatpush3.msra.mxu1 %v488_v62  ;;  %v731_v62 = vld [vmem:[%s2728_s3 + $0x3c8] sm:$0xff]  ;;  %v710_v1 = vld [vmem:[%s2728_s3 + $0x320] sm:$0xff]  ;;  %v708_v45 = vld [vmem:[%s2728_s3 + $0x310] sm:$0xff] }
 0x22f   :  { %1496 = vmatprep.subr.mxu1 %v503_v63  ;;  %v766_v63 = vld [vmem:[%s2728_s3 + $0x4e0] sm:$0xff]  ;;  %v1345_v39 = vld [vmem:[%s2728_s3 + $0x308] ss:$0 sm:$0xff] }
 0x230   :  { %1497 = vmatpush3.msra.mxu1 %v487_v25  ;;  %v765_v25 = vld [vmem:[%s2728_s3 + $0x4d8] sm:$0xff]  ;;  %v759_v46 = vld [vmem:[%s2728_s3 + $0x4a8] sm:$0xff] }
 0x231   :  { %1498 = vmatprep.subr.mxu1 %v502_v7  ;;  %v749_v7 = vld [vmem:[%s2728_s3 + $0x458] sm:$0xff] }
 0x232   :  { %1499 = vmatpush3.msra.mxu1 %v486_v10  ;;  %v729_v10 = vld [vmem:[%s2728_s3 + $0x3b8] sm:$0xff] }
 0x233   :  { %1500 = vmatprep.subr.mxu1 %v501_v12  ;;  %v713_v12 = vld [vmem:[%s2728_s3 + $0x338] sm:$0xff] }
 0x234   :  { %1501 = vmatpush3.msra.mxu1 %v485_v15  ;;  %v763_v15 = vld [vmem:[%s2728_s3 + $0x4c8] sm:$0xff] }
 0x235   :  { %1502 = vmatprep.subr.mxu1 %v500_v16  ;;  %v712_v16 = vld [vmem:[%s2728_s3 + $0x330] sm:$0xff] }
 0x236   :  { %1503 = vmatpush3.msra.mxu1 %v484_v17  ;;  %v747_v17 = vld [vmem:[%s2728_s3 + $0x448] sm:$0xff] }
 0x237   :  { %1504 = vmatprep.subr.mxu1 %v499_v22  ;;  %v711_v22 = vld [vmem:[%s2728_s3 + $0x328] sm:$0xff] }
 0x238   :  { %1505 = vmatpush3.msra.mxu1 %v483_v19  ;;  %v726_v19 = vld [vmem:[%s2728_s3 + $0x3a0] sm:$0xff] }
 0x239   :  { %1506 = vmatprep.subr.mxu1 %v498_v9  ;;  %v745_v9 = vld [vmem:[%s2728_s3 + $0x438] sm:$0xff] }
 0x23a   :  { %1507 = vmatpush3.msra.mxu1 %v482_v29  ;;  %v709_v29 = vld [vmem:[%s2728_s3 + $0x318] sm:$0xff] }
 0x23b   :  { %664 = vmatmul.mubr.f32.vlgmr.msra.gmra.mxu1 %v436_v8  ;;  %1552 = vmatprep.subr.mxu1 %v771_v50 }
 0x23c   :  { %668 = vmatprep.mubr.f32.mxu1 %v449_v32  ;;  %1553 = vmatpush3.msra.mxu1 %v755_v33 }
 0x23d   :  { %1554 = vmatprep.subr.mxu1 %v770_v37 }
 0x23e   :  { %1555 = vmatpush3.msra.mxu1 %v754_v52 }
 0x23f   :  { %669 = vmatmul.mubr.f32.gmra.mxu1 %v448_v41  ;;  %1556 = vmatprep.subr.mxu1 %v769_v36  ;;  %v741_v36 = vld [vmem:[%s2728_s3 + $0x418] sm:$0xff] }
 0x240   :  { %673 = vmatprep.mubr.f32.mxu1 %v2209_v43  ;;  %v721_v43 = vld [vmem:[%s2728_s3 + $0x378] sm:$0xff]  ;;  %1557 = vmatpush3.msra.mxu1 %v753_v54  ;;  %v756_v54 = vld [vmem:[%s2728_s3 + $0x490] sm:$0xff] }
 0x241   :  { %1558 = vmatprep.subr.mxu1 %v768_v55 }
 0x242   :  { %1559 = vmatpush3.msra.mxu1 %v752_v57  ;;  %v740_v57 = vld [vmem:[%s2728_s3 + $0x410] sm:$0xff] }
 0x243   :  { %674 = vmatmul.mubr.f32.gmra.mxu1 %v2200_v40  ;;  %v737_v40 = vld [vmem:[%s2728_s3 + $0x3f8] sm:$0xff]  ;;  %1560 = vmatprep.subr.mxu1 %v767_v59 }
 0x244   :  { %1521 = vmatprep.subr.mxu0 %v737_v40  ;;  %1561 = vmatpush3.msra.mxu1 %v751_v61  ;;  %v743_v40 = vld [vmem:[%s2728_s3 + $0x428] sm:$0xff] }
 0x245   :  { %1522 = vmatpush3.msra.mxu0 %v721_v43  ;;  %1562 = vmatprep.subr.mxu1 %v766_v63  ;;  %v758_v43 = vld [vmem:[%s2728_s3 + $0x4a0] sm:$0xff] }
 0x246   :  { %1523 = vmatprep.subr.mxu0 %v736_v47  ;;  %1563 = vmatpush3.msra.mxu1 %v750_v2  ;;  %v742_v47 = vld [vmem:[%s2728_s3 + $0x420] sm:$0xff] }
 0x247   :  { %1524 = vmatpush3.msra.mxu0 %v720_v48  ;;  %1564 = vmatprep.subr.mxu1 %v765_v25 }
 0x248   :  { %1525 = vmatprep.subr.mxu0 %v735_v49  ;;  %1565 = vmatpush3.msra.mxu1 %v749_v7  ;;  %v1791_v49 = vmov 0.0  }
 0x249   :  { %1526 = vmatpush3.msra.mxu0 %v719_v6  ;;  %1566 = vmatprep.subr.mxu1 %v764_v11 }
 0x24a   :  { %1527 = vmatprep.subr.mxu0 %v734_v51  ;;  %1567 = vmatpush3.msra.mxu1 %v748_v13  ;;  %v757_v51 = vld [vmem:[%s2728_s3 + $0x498] sm:$0xff] }
 0x24b   :  { %1528 = vmatpush3.msra.mxu0 %v718_v53  ;;  %1568 = vmatprep.subr.mxu1 %v763_v15 }
 0x24c   :  { %1529 = vmatprep.subr.mxu0 %v733_v28  ;;  %1569 = vmatpush3.msra.mxu1 %v747_v17  ;;  %v778_v17 = vld [vmem:[%s2728_s3 + $0x540] sm:$0xff] }
 0x24d   :  { %1530 = vmatpush3.msra.mxu0 %v717_v56  ;;  %1570 = vmatprep.subr.mxu1 %v762_v21 }
 0x24e   :  { %1531 = vmatprep.subr.mxu0 %v732_v58  ;;  %1571 = vmatpush3.msra.mxu1 %v746_v23  ;;  %v777_v23 = vld [vmem:[%s2728_s3 + $0x538] sm:$0xff] }
 0x24f   :  { %1532 = vmatpush3.msra.mxu0 %v716_v60  ;;  %1572 = vmatprep.subr.mxu1 %v761_v20  ;;  %v776_v20 = vld [vmem:[%s2728_s3 + $0x530] sm:$0xff] }
 0x250   :  { %1533 = vmatprep.subr.mxu0 %v731_v62  ;;  %1573 = vmatpush3.msra.mxu1 %v745_v9  ;;  %v775_v9 = vld [vmem:[%s2728_s3 + $0x528] sm:$0xff] }
 0x251   :  { %1534 = vmatpush3.msra.mxu0 %v715_v0  ;;  %1574 = vmatprep.subr.mxu1 %v760_v4 }
 0x252   :  { %1535 = vmatprep.subr.mxu0 %v730_v5  ;;  %1575 = vmatpush3.msra.mxu1 %v744_v24  ;;  %v772_v24 = vld [vmem:[%s2728_s3 + $0x510] sm:$0xff] }
 0x253   :  { %1536 = vmatpush3.msra.mxu0 %v714_v3  ;;  %1576 = vmatprep.subr.mxu1 %v759_v46  ;;  %v1096_v46 = vld [vmem:[%s2728_s3 + $0x5c0] sm:$0xff] }
 0x254   :  { %1537 = vmatprep.subr.mxu0 %v729_v10  ;;  %1577 = vmatpush3.msra.mxu1 %v743_v40  ;;  %v1095_v40 = vld [vmem:[%s2728_s3 + $0x5b8] sm:$0xff] }
 0x255   :  { %1538 = vmatpush3.msra.mxu0 %v713_v12  ;;  %1578 = vmatprep.subr.mxu1 %v758_v43  ;;  %v779_v12 = vld [vmem:[%s2728_s3 + $0x548] sm:$0xff] }
 0x256   :  { %1539 = vmatprep.subr.mxu0 %v728_v14  ;;  %1579 = vmatpush3.msra.mxu1 %v742_v47 }
 0x257   :  { %1540 = vmatpush3.msra.mxu0 %v712_v16  ;;  %1580 = vmatprep.subr.mxu1 %v757_v51 }
 0x258   :  { %1541 = vmatprep.subr.mxu0 %v727_v18  ;;  %1581 = vmatpush3.msra.mxu1 %v741_v36 }
 0x259   :  { %1542 = vmatpush3.msra.mxu0 %v711_v22  ;;  %1582 = vmatprep.subr.mxu1 %v756_v54 }
 0x25a   :  { %1543 = vmatprep.subr.mxu0 %v726_v19  ;;  %1583 = vmatpush3.msra.mxu1 %v740_v57  ;;  %v1092_v57 = vld [vmem:[%s2728_s3 + $0x5a0] sm:$0xff] }
 0x25b   :  { %1544 = vmatpush3.msra.mxu0 %v710_v1  ;;  %1638 = vmatprep.subr.mxu1 %v1791_v49 }
 0x25c   :  { %1545 = vmatprep.subr.mxu0 %v725_v30  ;;  %v774_v30 = vld [vmem:[%s2728_s3 + $0x520] sm:$0xff] }
 0x25d   :  { %1546 = vmatpush3.msra.mxu0 %v709_v29  ;;  %v773_v29 = vld [vmem:[%s2728_s3 + $0x518] sm:$0xff] }
 0x25e   :  { %1547 = vmatprep.subr.mxu0 %v724_v34 }
 0x25f   :  { %1548 = vmatpush3.msra.mxu0 %v708_v45  ;;  %v1097_v45 = vld [vmem:[%s2728_s3 + $0x5c8] sm:$0xff] }
 0x260   :  { %1619 = vmatprep.subr.mxu0 %v1791_v49 }
 0x2db   :  { %v1467_v26 = vpop.f32.mrf.mxu1 }
 0x2dd   :  { %v1468_v27 = vpop.f32.mrf.mxu1 }
 0x2de   :  { %v1469_v38 = vadd.f32 %v1468_v27, %v1467_v26  ;;  %v1006_v26 = vld [vmem:[%s2728_s3 + $0x590] sm:$0xff]  ;;  %v1005_v27 = vld [vmem:[%s2728_s3 + $0x588] sm:$0xff] }
 0x2e0   :  { %v586_v50 = vadd.f32 %v1469_v38, %v1345_v39  ;;  %v1098_v38 = vld [vmem:[%s2728_s3 + $0x5d0] sm:$0xff] }
 0x2e1   :  { %v1470_v31 = vpop.f32.mrf.mxu1 }
 0x2e3   :  { %v1471_v42 = vpop.f32.mrf.mxu1 }
 0x2e4   :  { %v1472_v6 = vadd.f32 %v1471_v42, %v1470_v31  ;;  %v1004_v31 = vld [vmem:[%s2728_s3 + $0x580] sm:$0xff]  ;;  %v1003_v42 = vld [vmem:[%s2728_s3 + $0x578] sm:$0xff] }
 0x2e5   :  { %v1473_v8 = vpop.f32.mrf.mxu1 }
 0x2e6   :  { %v591_v28 = vadd.f32 %v1472_v6, %v1345_v39 }
 0x2e7   :  { %v1474_v32 = vpop.f32.mrf.mxu1 }
 0x2e8   :  { %v1475_v35 = vadd.f32 %v1474_v32, %v1473_v8  ;;  %v1002_v8 = vld [vmem:[%s2728_s3 + $0x570] sm:$0xff]  ;;  %v1001_v32 = vld [vmem:[%s2728_s3 + $0x568] sm:$0xff] }
 0x2ea   :  { %v2537_v41 = vadd.f32 %v1475_v35, %v1345_v39  ;;  %v1000_v35 = vld [vmem:[%s2728_s3 + $0x560] sm:$0xff]  ;;  %v999_v39 = vld [vmem:[%s2728_s3 + $0x558] sm:$0xff] }
 0x2fb   :  { %v1508_v44 = vpop.f32.mrf.mxu1 }
 0x2fd   :  { %v1509_v48 = vpop.f32.mrf.mxu1 }
 0x2fe   :  { %v1510_v33 = vadd.f32 %v1509_v48, %v1508_v44  ;;  %v1086_v44 = vld [vmem:[%s2730_s1] sm:$0x3] }
 0x2ff   :  { %v1511_v37 = vpop.f32.mrf.mxu1 }
 0x300   :  { %v666_v52 = vadd.f32 %v1510_v33, %v586_v50  ;;  %v1346_v33 = vld [vmem:[%s2728_s3 + $0x550] ss:$0 sm:$0xff] }
 0x301   :  { %v1512_v53 = vpop.f32.mrf.mxu1 }
 0x302   :  { %v679_v55 = vmax.f32 %v666_v52, 0.0  ;;  %v1513_v56 = vadd.f32 %v1512_v53, %v1511_v37 }
 0x303   :  { %v1514_v13 = vpop.f32.mrf.mxu1 }
 0x304   :  { %v671_v58 = vadd.f32 %v1513_v56, %v591_v28  ;;  %v683_v59 = vrot.slane %v679_v55, 2  ;;  %v689_v60 = vrot.slane %v679_v55, 6  ;;  %v687_v7 = vrot.slane %v679_v55, 4  ;;  %v1093_v56 = vld [vmem:[%s2728_s3 + $0x5a8] sm:$0xff] }
 0x305   :  { %v1515_v19 = vpop.f32.mrf.mxu1 }
 0x306   :  { %v680_v61 = vmax.f32 %v671_v58, 0.0  ;;  %v1766_v62 = vpack.i.bf16 %v683_v59, %v689_v60  ;;  %v1516_v1 = vadd.f32 %v1515_v19, %v1514_v13  ;;  %v1185_v58 = vld [vmem:[%s2731_s2] sm:$0x3]  ;;  %v1348_v59 = vld [vmem:[%s2728_s3 + $0x598] ss:$0 sm:$0xff] }
 0x307   :  { %v1209_v19 = vld [vmem:[%s2728_s3 + $0x5f8] sm:$0xff] }
 0x308   :  { %1767 = vrot.lane.b32.xlu0 %v1766_v62, %s1789_s15  ;;  %v694_v63 = vrot.slane %v680_v61, 2  ;;  %v700_v0 = vrot.slane %v680_v61, 6  ;;  %v698_v18 = vrot.slane %v680_v61, 4  ;;  %v676_v4 = vadd.f32 %v1516_v1, %v2537_v41  ;;  %v1099_v41 = vld [vmem:[%s2728_s3 + $0x5d8] sm:$0xff]  ;;  %v1207_v1 = vld [vmem:[%s2728_s3 + $0x5e8] sm:$0xff] }
 0x30a   :  { %v1771_v2 = vpack.i.bf16 %v694_v63, %v700_v0  ;;  %v681_v34 = vmax.f32 %v676_v4, 0.0 }
 0x30c   :  { %1772 = vrot.lane.b32.xlu1 %v1771_v2, %s1789_s15  ;;  %1088 = vrot.lane.b32.xlu0 %v1086_v44, %s1788_s0 }
 0x310   :  { %1187 = vrot.lane.b32.xlu0 %v1185_v58, %s1788_s0 }
 0x37a   :  { %v1768_v5 = vpop.permute.xlu0 %1767 }
 0x37b   :  { %v1770_v25 = vunpack.i.h.bf16 %v1768_v5  ;;  %v1769_v3 = vunpack.i.l.bf16 %v1768_v5  ;;  %v1350_v5 = vld [vmem:[%s2728_s3 + $0x5e0] ss:$0 sm:$0xff] }
 0x37d   :  { %v705_v10 = vsel %vm298_vm1, %v687_v7, %v1769_v3  ;;  %v704_v11 = vsel %vm298_vm1, %v679_v55, %v1770_v25  ;;  %v1094_v55 = vld [vmem:[%s2728_s3 + $0x5b0] sm:$0xff] }
 0x37e   :  { %v1773_v14 = vpop.permute.xlu1 %1772  ;;  %852 = vmatprep.mubr.f32.mxu0 %v705_v10  ;;  %v1089_v63 = vpop.permute.xlu0 %1088 }
 0x37f   :  { %v1775_v15 = vunpack.i.h.bf16 %v1773_v14  ;;  %v1774_v16 = vunpack.i.l.bf16 %v1773_v14  ;;  %853 = vmatmul.mubr.f32.vlgmr.msra.gmra.mxu0 %v704_v11 }
 0x380   :  { %1620 = vmatpush3.msra.mxu0 %v779_v12  ;;  %1635 = vmatprep.mubr.msk.f32.mxu0 %vm1792_vm6, %v1791_v49 }
 0x381   :  { %1621 = vmatprep.subr.mxu0 %v1791_v49  ;;  %v707_v21 = vsel %vm298_vm1, %v698_v18, %v1774_v16  ;;  %v706_v22 = vsel %vm298_vm1, %v680_v61, %v1775_v15 }
 0x382   :  { %1622 = vmatpush3.msra.mxu0 %v778_v17  ;;  %922 = vmatprep.mubr.f32.mxu1 %v707_v21  ;;  %v1188_v17 = vpop.permute.xlu0 %1187 }
 0x383   :  { %1623 = vmatprep.subr.mxu0 %v1791_v49  ;;  %923 = vmatmul.mubr.f32.vlgmr.msra.gmra.mxu1 %v706_v22 }
 0x384   :  { %1624 = vmatpush3.msra.mxu0 %v777_v23  ;;  %1654 = vmatprep.mubr.msk.f32.mxu1 %vm1792_vm6, %v1791_v49  ;;  %v1210_v23 = vld [vmem:[%s2728_s3 + $0x600] sm:$0xff] }
 0x385   :  { %1625 = vmatprep.subr.mxu0 %v1791_v49  ;;  %1639 = vmatpush3.msra.mxu1 %v1006_v26 }
 0x386   :  { %1626 = vmatpush3.msra.mxu0 %v776_v20  ;;  %1640 = vmatprep.subr.mxu1 %v1791_v49  ;;  %v1208_v20 = vld [vmem:[%s2728_s3 + $0x5f0] sm:$0xff] }
 0x387   :  { %1627 = vmatprep.subr.mxu0 %v1791_v49  ;;  %1641 = vmatpush3.msra.mxu1 %v1005_v27 }
 0x388   :  { %1628 = vmatpush3.msra.mxu0 %v775_v9  ;;  %1642 = vmatprep.subr.mxu1 %v1791_v49 }
 0x389   :  { %1629 = vmatprep.subr.mxu0 %v1791_v49  ;;  %1643 = vmatpush3.msra.mxu1 %v1004_v31 }
 0x38a   :  { %1630 = vmatpush3.msra.mxu0 %v774_v30  ;;  %1644 = vmatprep.subr.mxu1 %v1791_v49 }
 0x38b   :  { %1631 = vmatprep.subr.mxu0 %v1791_v49  ;;  %1645 = vmatpush3.msra.mxu1 %v1003_v42 }
 0x38c   :  { %1632 = vmatpush3.msra.mxu0 %v773_v29  ;;  %1646 = vmatprep.subr.mxu1 %v1791_v49 }
 0x38d   :  { %1633 = vmatprep.subr.mxu0 %v1791_v49  ;;  %1647 = vmatpush3.msra.mxu1 %v1002_v8 }
 0x38e   :  { %1634 = vmatpush3.msra.mxu0 %v772_v24  ;;  %1648 = vmatprep.subr.mxu1 %v1791_v49  ;;  %v1353_v24 = vld [vmem:[%s2728_s3 + $0x608] ss:$0 sm:$0xff]  ;;  %s1793_s3 = smov 6  }
 0x38f   :  { %1636 = vmatmul.mubr.msk.f32.vlgmr.msra.gmra.mxu0 %vm298_vm1, %v681_v34  ;;  %1657 = vmatprep.subr.mxu0 %v1791_v49 }
 0x390   :  { %1673 = vmatprep.mubr.msk.f32.mxu0 %vm1792_vm6, %v1791_v49  ;;  %1649 = vmatpush3.msra.mxu1 %v1001_v32 }
 0x391   :  { %1650 = vmatprep.subr.mxu1 %v1791_v49  ;;  %1658 = vmatpush3.msra.mxu0 %v1099_v41 }
 0x392   :  { %1651 = vmatpush3.msra.mxu1 %v1000_v35  ;;  %1659 = vmatprep.subr.mxu0 %v1791_v49 }
 0x393   :  { %1652 = vmatprep.subr.mxu1 %v1791_v49  ;;  %1660 = vmatpush3.msra.mxu0 %v1098_v38 }
 0x394   :  { %1653 = vmatpush3.msra.mxu1 %v999_v39  ;;  %1661 = vmatprep.subr.mxu0 %v1791_v49 }
 0x395   :  { %1676 = vmatprep.subr.mxu1 %v1791_v49  ;;  %1662 = vmatpush3.msra.mxu0 %v1097_v45 }
 0x396   :  { %1663 = vmatprep.subr.mxu0 %v1791_v49 }
 0x397   :  { %1664 = vmatpush3.msra.mxu0 %v1096_v46 }
 0x398   :  { %1665 = vmatprep.subr.mxu0 %v1791_v49 }
 0x399   :  { %1666 = vmatpush3.msra.mxu0 %v1095_v40 }
 0x39a   :  { %1667 = vmatprep.subr.mxu0 %v1791_v49 }
 0x39b   :  { %1668 = vmatpush3.msra.mxu0 %v1094_v55 }
 0x39c   :  { %1669 = vmatprep.subr.mxu0 %v1791_v49 }
 0x39d   :  { %1670 = vmatpush3.msra.mxu0 %v1093_v56 }
 0x39e   :  { %1671 = vmatprep.subr.mxu0 %v1791_v49 }
 0x39f   :  { %1672 = vmatpush3.msra.mxu0 %v1092_v57 }
 0x43f   :  { %v1549_v43 = vpop.f32.mrf.mxu0 }
 0x441   :  { %v1550_v48 = vpop.f32.mrf.mxu0 }
 0x442   :  { %v1551_v6 = vadd.f32 %v1550_v48, %v1549_v43 }
 0x443   :  { %v1584_v47 = vpop.f32.mrf.mxu1 }
 0x444   :  { %v855_v51 = vadd.f32 %v1551_v6, %v1346_v33 }
 0x445   :  { %v1585_v50 = vpop.f32.mrf.mxu1 }
 0x446   :  { %v1586_v37 = vadd.f32 %v1585_v50, %v1584_v47 }
 0x448   :  { %v925_v52 = vadd.f32 %v1586_v37, %v855_v51 }
 0x44f   :  { %v994_v36 = vpop.f32.mrf.mxu0 }
 0x450   :  { %v995_v53 = vadd.f32 %v994_v36, %v925_v52 }
 0x451   :  { %v1637_v54 = vpop.f32.mrf.mxu0 }
 0x452   :  { %v998_v28 = vmax.f32 %v995_v53, 0.0 }
 0x454   :  { %1655 = vmatmul.mubr.msk.f32.vlgmr.msra.gmra.mxu1 %vm298_vm1, %v998_v28 }
 0x455   :  { %1684 = vmatprep.mubr.msk.f32.mxu1 %vm1792_vm6, %v1791_v49  ;;  %1677 = vmatpush3.msra.mxu1 %v1210_v23 }
 0x456   :  { %1678 = vmatprep.subr.mxu1 %v1791_v49 }
 0x457   :  { %1679 = vmatpush3.msra.mxu1 %v1209_v19 }
 0x458   :  { %1680 = vmatprep.subr.mxu1 %v1791_v49 }
 0x459   :  { %1681 = vmatpush3.msra.mxu1 %v1208_v20 }
 0x45a   :  { %1682 = vmatprep.subr.mxu1 %v1791_v49 }
 0x45b   :  { %1683 = vmatpush3.msra.mxu1 %v1207_v1 }
 0x514   :  { %v1081_v60 = vpop.f32.mrf.mxu1 }
 0x515   :  { %v1082_v61 = vadd.f32 %v1348_v59, %v1081_v60 }
 0x516   :  { %v1656_v62 = vpop.f32.mrf.mxu1 }
 0x517   :  { %v1085_v0 = vmax.f32 %v1082_v61, 0.0 }
 0x519   :  { %v1091_v2 = vsel %vm295_vm0, %v1085_v0, %v1089_v63 }
 0x51a   :  { %1674 = vmatmul.mubr.msk.f32.vlgmr.msra.gmra.mxu0 %vm298_vm1, %v1091_v2 }
 0x5da   :  { %v1174_v25 = vpop.f32.mrf.mxu0 }
 0x5db   :  { %v1175_v3 = vadd.f32 %v1350_v5, %v1174_v25 }
 0x5dc   :  { %v1675_v7 = vpop.f32.mrf.mxu0 }
 0x5dd   :  { %1776 = vtanh.f32 %v1175_v3  ;;  %v1352_v11 = vmul.f32 -1.442695, %v1175_v3 }
 0x5df   :  { %1778 = vpow2.f32 %v1352_v11 }
 0x5ea   :  { %v1777_v10 = vpop.eup %1776 }
 0x5eb   :  { %1192 = vrot.lane.b32.xlu1 %v1777_v10, %s1789_s15 }
 0x5ec   :  { %v1779_v12 = vpop.eup %1778 }
 0x5ed   :  { %v1181_v13 = vadd.f32 1.0, %v1779_v12 }
 0x5ef   :  { %1780 = vrcp.f32 %v1181_v13 }
 0x5fc   :  { %v1781_v14 = vpop.eup %1780 }
 0x5fd   :  { %v1190_v18 = vmul.f32 %v1781_v14, %v1188_v17 }
 0x65d   :  { %v1193_v15 = vpop.permute.xlu1 %1192 }
 0x65e   :  { %v1195_v16 = vmul.f32 %v1781_v14, %v1193_v15 }
 0x660   :  { %1197 = vrot.lane.b32.xlu1 %v1195_v16, %s1788_s0 }
 0x6d2   :  { %v1198_v21 = vpop.permute.xlu1 %1197 }
 0x6d3   :  { %v1200_v22 = vadd.f32 %v1198_v21, %v1190_v18 }
 0x6d5   :  { %1782 = vtanh.f32 %v1200_v22 }
 0x6e2   :  { %v1783_v9 = vpop.eup %1782 }
 0x6e3   :  { %1203 = vrot.lane.b32.xlu0 %v1783_v9, %s1789_s15  ;;  %s1795_s15 = smov 51  }
 0x755   :  { %v1204_v30 = vpop.permute.xlu0 %1203 }
 0x756   :  { %v1206_v4 = vmul.f32 %v1781_v14, %v1204_v30 }
 0x758   :  { %1217 = vrot.lane.b32.xlu1 %v1206_v4, %s1788_s0  ;;  %s1794_s0 = smov 122  }
 0x7ca   :  { %v1218_v29 = vpop.permute.xlu1 %1217 }
 0x7cb   :  { %1685 = vmatmul.mubr.msk.f32.vlgmr.msra.gmra.mxu1 %vm295_vm0, %v1218_v29 }
 0x88b   :  { %v1287_v34 = vpop.f32.mrf.mxu1 }
 0x88c   :  { %v1288_v26 = vadd.f32 %v1353_v24, %v1287_v34 }
 0x88d   :  { %v1686_v27 = vpop.f32.mrf.mxu1 }
 0x88e   :  { %v1292_v49 = vsel %vm1291_vm7, %v1288_v26, -inf }
 0x88f   :  { %1293 = vmax.xlane.f32.xlu0 %v1292_v49 }
 0x918   :  { %v1294_v31 = vpop.xlane.xlu0 %1293 }
 0x919   :  { %v1295_v42 = vsub.f32 %v1288_v26, %v1294_v31 }
 0x91b   :  { %v1296_v8 = vmul.f32 1.442695, %v1295_v42 }
 0x91d   :  { %1784 = vpow2.f32 %v1296_v8 }
 0x92a   :  { %v1785_v32 = vpop.eup %1784 }
 0x92b   :  { %v1298_v35 = vsel %vm1291_vm7, %v1785_v32, 0.0 }
 0x92c   :  { %1299 = vadd.xlane.f32.xlu1 %v1298_v35 }
 0x9b5   :  { %v1300_v39 = vpop.xlane.xlu1 %1299 }
 0x9b6   :  { %1786 = vrcp.f32 %v1300_v39 }
 0x9c3   :  { %v1787_v41 = vpop.eup %1786 }
 0x9c4   :  { %v1302_v38 = vmul.f32 %v1787_v41, %v1785_v32 }
 0x9c6   :  { %v1303_v44 = vmin.f32 %v1302_v38, 1.0 }
 0x9c8   :  { %1305 = vrot.lane.b32.xlu0 %v1303_v44, %s1793_s3 }
 0xa3a   :  { %v1306_v45 = vpop.permute.xlu0 %1305 }
 0xa3b   :  { %v1308_v46 = vmul.f32 %v1306_v45, %v1288_v26  ;;  %v1328_v50 = vsel %vm1327_vm8, %v1288_v26, %v1306_v45 }
 0xa3d   :  { %1310 = vrot.lane.b32.xlu1 %v1308_v46, %s1794_s0 }
 0xa41   :  { %1317 = vrot.lane.b32.xlu1 %v1288_v26, %s1793_s3 }
 0xa45   :  { %1320 = vrot.lane.b32.xlu1 %v1206_v4, %s1795_s15 }
 0xa49   :  { %1324 = vrot.lane.b32.xlu1 %v1200_v22, %s1796_s16 }
 0xaaf   :  { %v1311_v40 = vpop.permute.xlu1 %1310 }
 0xab0   :  { %v1313_v43 = vsel %vm1291_vm7, %v1311_v40, 0.0 }
 0xab1   :  { %1314 = vadd.xlane.f32.xlu0 %v1313_v43 }
 0xab3   :  { %v1318_v47 = vpop.permute.xlu1 %1317 }
 0xab4   :  { %v1330_v6 = vsel %vm1329_vm9, %v1328_v50, %v1318_v47 }
 0xab7   :  { %v1321_v48 = vpop.permute.xlu1 %1320 }
 0xabb   :  { %v1325_v51 = vpop.permute.xlu1 %1324 }
 0xb3a   :  { %v1315_v33 = vpop.xlane.xlu0 %1314 }
 0xb3b   :  { %v1332_v37 = vsel %vm1331_vm10, %v1330_v6, %v1315_v33 }
 0xb3c   :  { %v1334_v52 = vsel %vm1333_vm11, %v1332_v37, %v1321_v48 }
 0xb3d   :  { %v1336_v36 = vsel %vm1335_vm12, %v1334_v52, %v1325_v51 }
 0xb3e   :  { %v1338_v53 = vsel %vm1337_vm13, %v1336_v36, 0.0 }
 0xb3f   :  { %1339 = vst [vmem:[%s2732_s4] sm:$0x3] %v1338_v53 }

</bundles_post_ra>
